<compile_context>
chip_gen: v5e
topology: v5e:2x2
jax: 0.10.0
libtpu: 0.0.40
codegen_flags: <defaults>
</compile_context>

<pallas_src>
import jax
import jax.numpy as jnp
from jax import lax
from jax.experimental import pallas as pl
from jax.experimental.pallas import tpu as pltpu

_LIF_TAU = 2.0
_LIF_INV_TAU = 1.0 / _LIF_TAU
_LIF_V_TH = 1.0                      # spikingjelly defaults: v_threshold=1.0, v_reset=0.0
_TM_MAX = 512                        # row-tile upper bound (v6e/v5e); picker shrinks for VMEM / megacore
_VMEM_BUDGET = 48 * 1024 * 1024      # conservative block-footprint budget (fits v7x 64 MiB)


def _round_up(n, m):
    return -(-n // m) * m


# -----------------------------------------------------------------------------
# Fused kernel: LIF1 -> matmul1(+BN1) -> LIF2 -> matmul2(+BN2), per (row-tile, t)
# -----------------------------------------------------------------------------
def _fused_mlp_kernel(x_ref, w1_ref, b1_ref, w2_ref, b2_ref, o_ref, v1_ref, v2_ref):
    """x_ref: (1, tm, Cin) bf16   w*_ref: bf16 weights with BN scale folded in
    b*_ref: (1, C) f32 fused bias  o_ref: (1, tm, Cout) bf16
    v1_ref/v2_ref: f32 membrane-potential scratch, persist across the inner T axis."""
    t = pl.program_id(1)

    @pl.when(t == 0)
    def _():
        v1_ref[...] = jnp.zeros_like(v1_ref)
        v2_ref[...] = jnp.zeros_like(v2_ref)

    # ---- stage 1: LIF -> 1x1 conv (MXU) -> folded BN ------------------------------
    x = x_ref[0].astype(jnp.float32)
    v1 = v1_ref[...] + (x - v1_ref[...]) * jnp.float32(_LIF_INV_TAU)
    fire1 = v1 >= _LIF_V_TH
    v1_ref[...] = jnp.where(fire1, 0.0, v1)                 # hard reset, no extra mul
    h = jnp.dot(fire1.astype(jnp.bfloat16), w1_ref[...],
                preferred_element_type=jnp.float32) + b1_ref[...]

    # ---- stage 2: LIF -> 1x1 conv (MXU) -> folded BN ------------------------------
    v2 = v2_ref[...] + (h - v2_ref[...]) * jnp.float32(_LIF_INV_TAU)
    fire2 = v2 >= _LIF_V_TH
    v2_ref[...] = jnp.where(fire2, 0.0, v2)
    acc = jnp.dot(fire2.astype(jnp.bfloat16), w2_ref[...],
                  preferred_element_type=jnp.float32) + b2_ref[...]
    o_ref[0] = acc.astype(o_ref.dtype)


# -----------------------------------------------------------------------------
# Tile sizing: fit VMEM budget and keep >= 2 row tiles for v7x megacore sharding.
# -----------------------------------------------------------------------------
def _block_footprint_bytes(tm, cin, hid, cout):
    x_blk = tm * cin * 2                         # bf16, double-buffered
    o_blk = tm * cout * 2                        # bf16, double-buffered
    wb = (cin * hid + hid * cout) * 2 + (hid + cout) * 4
    scr = tm * (cin + hid) * 4                   # f32 membrane scratches
    return 2 * (x_blk + o_blk) + 2 * wb + scr


def _pick_tm(M, cin, hid, cout, tm_max):
    tm = min(tm_max, _round_up(M, 8))
    # ensure at least 2 row tiles so the 'parallel' axis shards across both v7x TCs
    if M > 8 and _round_up(M, tm) // tm < 2:
        tm = max(8, _round_up(_round_up(M, 2) // 2, 8))
    while tm > 8 and _block_footprint_bytes(tm, cin, hid, cout) > _VMEM_BUDGET:
        tm = max(8, _round_up(tm // 2, 8))
    return tm, _block_footprint_bytes(tm, cin, hid, cout)


# -----------------------------------------------------------------------------
# Fused two-stage MLP over channels-last activations: (T, M, Cin) bf16 -> (T, M, Cout) bf16
# -----------------------------------------------------------------------------
def mlp_fused(x, w1, b1, w2, b2, tm_max=_TM_MAX):
    T, M, Cin = x.shape
    Hid = w1.shape[1]
    Cout = w2.shape[1]

    tm, footprint = _pick_tm(M, Cin, Hid, Cout, tm_max)
    Mp = _round_up(M, tm)
    if Mp != M:
        # zero pad rows -> zero membrane/spikes for fc1; fc2 pad garbage is sliced off below
        x = jnp.pad(x, ((0, 0), (0, Mp - M), (0, 0)))
    grid = (Mp // tm, T)

    flops = 2 * T * Mp * (Cin * Hid + Hid * Cout)
    bytes_accessed = 2 * T * Mp * (Cin + Cout) + 2 * (Cin * Hid + Hid * Cout) + 4 * (Hid + Cout)
    vmem_limit = max(32 * 1024 * 1024,
                     min(int(1.5 * footprint) + (2 << 20), 64 * 1024 * 1024))

    out = pl.pallas_call(
        _fused_mlp_kernel,
        out_shape=jax.ShapeDtypeStruct((T, Mp, Cout), jnp.bfloat16),
        grid=grid,
        in_specs=[
            pl.BlockSpec((1, tm, Cin), lambda i, t: (t, i, 0)),
            # Grid-invariant operands (index_map constant) are fetched once and stay
            # VMEM-resident.  (pipeline_mode=pl.Buffered(1) would trim the spare buffer
            # on v7x; omitted for portability.)
            pl.BlockSpec((Cin, Hid), lambda i, t: (0, 0)),
            pl.BlockSpec((1, Hid), lambda i, t: (0, 0)),
            pl.BlockSpec((Hid, Cout), lambda i, t: (0, 0)),
            pl.BlockSpec((1, Cout), lambda i, t: (0, 0)),
        ],
        out_specs=pl.BlockSpec((1, tm, Cout), lambda i, t: (t, i, 0)),
        scratch_shapes=[pltpu.VMEM((tm, Cin), jnp.float32),   # fc1 membrane potential
                        pltpu.VMEM((tm, Hid), jnp.float32)],  # fc2 membrane potential
        compiler_params=pltpu.CompilerParams(
            dimension_semantics=("parallel", "arbitrary"),     # T must stay inner/arbitrary
            vmem_limit_bytes=int(vmem_limit)),
        cost_estimate=pl.CostEstimate(flops=int(flops), transcendentals=0,
                                      bytes_accessed=int(bytes_accessed)),
    )(x, w1, b1.reshape(1, Hid), w2, b2.reshape(1, Cout))

    if Mp != M:
        out = out[:, :M, :]
    return out


# -----------------------------------------------------------------------------
# Parameters: conv 1x1 weights in PyTorch (Cout, Cin) layout, BN folded into columns.
# -----------------------------------------------------------------------------
def init_params(key, in_features, hidden_features, out_features, eps=1e-5):
    def layer(k, cin, cout):
        kw, kb, kg, kbe, km, kv = jax.random.split(k, 6)
        w_pt = jax.random.normal(kw, (cout, cin), jnp.float32) * (1.0 / cin) ** 0.5
        b_conv = 0.1 * jax.random.normal(kb, (cout,), jnp.float32)
        gamma = 1.0 + 0.1 * jax.random.normal(kg, (cout,), jnp.float32)
        beta = 0.1 * jax.random.normal(kbe, (cout,), jnp.float32)
        rmean = 0.1 * jax.random.normal(km, (cout,), jnp.float32)
        rvar = 1.0 + 0.1 * jax.random.uniform(kv, (cout,), jnp.float32)
        scale = gamma * lax.rsqrt(rvar + eps)
        # bn(conv(x)) = x @ (W^T * scale) + (scale*b_conv + beta - scale*mean)
        w_fused = (w_pt.T * scale[None, :]).astype(jnp.bfloat16)   # (Cin, Cout) bf16 MXU operand
        bias_fused = scale * b_conv + beta - scale * rmean          # (Cout,) f32
        return w_fused, bias_fused

    k1, k2 = jax.random.split(key)
    return {"fc1": layer(k1, in_features, hidden_features),
            "fc2": layer(k2, hidden_features, out_features)}


# -----------------------------------------------------------------------------
# MLP forward:  x -> fc1_lif -> fc1_conv -> fc1_bn -> fc2_lif -> fc2_conv -> fc2_bn
# -----------------------------------------------------------------------------
def mlp_forward(x, params):
    T, B, C, H, W = x.shape
    M = B * H * W
    # (T,B,C,H,W) -> (T, B*H*W, C): channels on the 128-lane axis; cast activations to bf16.
    # TODO(synk): a full Spikformer would keep channels-last across blocks to avoid these
    #             boundary transposes; kept here only to match the module interface.
    h = jnp.transpose(x, (0, 1, 3, 4, 2)).reshape(T, M, C).astype(jnp.bfloat16)
    w1, b1 = params["fc1"]
    w2, b2 = params["fc2"]
    out = mlp_fused(h, w1, b1, w2, b2)                     # (T, M, Cout) bf16
    Cout = out.shape[-1]
    out = out.reshape(T, B, H, W, Cout).astype(x.dtype)
    return jnp.transpose(out, (0, 1, 4, 2, 3))


if __name__ == "__main__":
    # Small shapes consistent with the module: T=4 timesteps, batch=2, channels=16,
    # 16x16 spatial, hidden=32, out_features defaults to in_features.
    T, B, C, H, W, HID = 4, 2, 16, 16, 16, 32
    key = jax.random.PRNGKey(0)
    kx, kp = jax.random.split(key)
    x = jax.random.normal(kx, (T, B, C, H, W), jnp.float32)
    params = init_params(kp, C, HID, C)

    fwd = jax.jit(lambda xx: mlp_forward(xx, params))
    out = jax.block_until_ready(fwd(x))

    assert out.shape == (T, B, C, H, W), out.shape
    assert bool(jnp.all(jnp.isfinite(out)))
    print("KERNEL_OK")
</pallas_src>

<mosaic_0001>
module attributes {stable_mosaic.version = 11 : i64} {
  func.func @_fused_mlp_kernel(%arg0: i32, %arg1: i32, %arg2: memref<1x256x16xbf16, #tpu.memory_space<vmem>>, %arg3: memref<16x32xbf16, #tpu.memory_space<vmem>>, %arg4: memref<1x32xf32, #tpu.memory_space<vmem>>, %arg5: memref<32x16xbf16, #tpu.memory_space<vmem>>, %arg6: memref<1x16xf32, #tpu.memory_space<vmem>>, %arg7: memref<1x256x16xbf16, #tpu.memory_space<vmem>>, %arg8: memref<256x16xf32, #tpu.memory_space<vmem>>, %arg9: memref<256x32xf32, #tpu.memory_space<vmem>>) attributes {dimension_semantics = [#tpu.dimension_semantics<parallel>, #tpu.dimension_semantics<arbitrary>], iteration_bounds = array<i64: 2, 4>, scalar_prefetch = 0 : i64, scratch_operands = 2 : i64, tpu.core_type = #tpu.core_type<tc>, window_params = [{transform_indices = @transform_0, window_bounds = array<i64: 1, 256, 16>}, {pipeline_mode = #tpu.pipeline_mode<synchronous>, transform_indices = @transform_1, window_bounds = array<i64: 16, 32>}, {pipeline_mode = #tpu.pipeline_mode<synchronous>, transform_indices = @transform_2, window_bounds = array<i64: 1, 32>}, {pipeline_mode = #tpu.pipeline_mode<synchronous>, transform_indices = @transform_3, window_bounds = array<i64: 32, 16>}, {pipeline_mode = #tpu.pipeline_mode<synchronous>, transform_indices = @transform_4, window_bounds = array<i64: 1, 16>}, {transform_indices = @transform_5, window_bounds = array<i64: 1, 256, 16>}]} {
    %c0_i32 = arith.constant 0 : i32
    %0 = arith.cmpi eq, %arg1, %c0_i32 : i32
    %1 = arith.extui %0 : i1 to i32
    %c0_i32_0 = arith.constant 0 : i32
    %2 = arith.cmpi ne, %1, %c0_i32_0 : i32
    scf.if %2 {
      %cst_33 = arith.constant 0.000000e+00 : f32
      %48 = vector.broadcast %cst_33 : f32 to vector<256x16xf32>
      %c0_34 = arith.constant 0 : index
      %c0_35 = arith.constant 0 : index
      %49 = vector.load %arg8[%c0_34, %c0_35] : memref<256x16xf32, #tpu.memory_space<vmem>>, vector<256x16xf32>
      tpu.vector_store %arg8[%c0_34, %c0_35], %48 {strides = array<i32>} : memref<256x16xf32, #tpu.memory_space<vmem>>, vector<256x16xf32>,
      %cst_36 = arith.constant 0.000000e+00 : f32
      %50 = vector.broadcast %cst_36 : f32 to vector<256x32xf32>
      %c0_37 = arith.constant 0 : index
      %c0_38 = arith.constant 0 : index
      %51 = vector.load %arg9[%c0_37, %c0_38] : memref<256x32xf32, #tpu.memory_space<vmem>>, vector<256x32xf32>
      tpu.vector_store %arg9[%c0_37, %c0_38], %50 {strides = array<i32>} : memref<256x32xf32, #tpu.memory_space<vmem>>, vector<256x32xf32>,
    } else {
    }
    %c0 = arith.constant 0 : index
    %c0_1 = arith.constant 0 : index
    %c0_2 = arith.constant 0 : index
    %3 = vector.load %arg2[%c0, %c0_1, %c0_2] : memref<1x256x16xbf16, #tpu.memory_space<vmem>>, vector<1x256x16xbf16>
    %4 = vector.shape_cast %3 : vector<1x256x16xbf16> to vector<256x16xbf16>
    %5 = arith.extf %4 : vector<256x16xbf16> to vector<256x16xf32>
    %c0_3 = arith.constant 0 : index
    %c0_4 = arith.constant 0 : index
    %6 = vector.load %arg8[%c0_3, %c0_4] : memref<256x16xf32, #tpu.memory_space<vmem>>, vector<256x16xf32>
    %c0_5 = arith.constant 0 : index
    %c0_6 = arith.constant 0 : index
    %7 = vector.load %arg8[%c0_5, %c0_6] : memref<256x16xf32, #tpu.memory_space<vmem>>, vector<256x16xf32>
    %8 = arith.subf %5, %7 : vector<256x16xf32>
    %cst = arith.constant 5.000000e-01 : f32
    %9 = vector.broadcast %cst : f32 to vector<256x16xf32>
    %10 = arith.mulf %8, %9 : vector<256x16xf32>
    %11 = arith.addf %6, %10 : vector<256x16xf32>
    %cst_7 = arith.constant 1.000000e+00 : f32
    %12 = vector.broadcast %cst_7 : f32 to vector<256x16xf32>
    %13 = arith.cmpf oge, %11, %12 : vector<256x16xf32>
    %cst_8 = arith.constant 0.000000e+00 : f32
    %14 = vector.broadcast %cst_8 : f32 to vector<256x16xf32>
    %15 = arith.select %13, %14, %11 : vector<256x16xi1>, vector<256x16xf32>
    %c0_9 = arith.constant 0 : index
    %c0_10 = arith.constant 0 : index
    %16 = vector.load %arg8[%c0_9, %c0_10] : memref<256x16xf32, #tpu.memory_space<vmem>>, vector<256x16xf32>
    tpu.vector_store %arg8[%c0_9, %c0_10], %15 {strides = array<i32>} : memref<256x16xf32, #tpu.memory_space<vmem>>, vector<256x16xf32>,
    %17 = arith.extui %13 : vector<256x16xi1> to vector<256x16xi32>
    %18 = arith.sitofp %17 : vector<256x16xi32> to vector<256x16xf32>
    %19 = arith.truncf %18 : vector<256x16xf32> to vector<256x16xbf16>
    %c0_11 = arith.constant 0 : index
    %c0_12 = arith.constant 0 : index
    %20 = vector.load %arg3[%c0_11, %c0_12] : memref<16x32xbf16, #tpu.memory_space<vmem>>, vector<16x32xbf16>
    %cst_13 = arith.constant dense<0.000000e+00> : vector<256x32xf32>
    %21 = tpu.matmul %19, %20, %cst_13 {dimension_numbers = #tpu.dot_dimension_numbers<[1], [0], [0], [1], [0, 0, 1, 1], [], []>} : vector<256x16xbf16>, vector<16x32xbf16>, vector<256x32xf32> -> vector<256x32xf32>
    %c0_14 = arith.constant 0 : index
    %c0_15 = arith.constant 0 : index
    %22 = vector.load %arg4[%c0_14, %c0_15] : memref<1x32xf32, #tpu.memory_space<vmem>>, vector<1x32xf32>
    %23 = vector.broadcast %22 : vector<1x32xf32> to vector<256x32xf32>
    %24 = arith.addf %21, %23 : vector<256x32xf32>
    %c0_16 = arith.constant 0 : index
    %c0_17 = arith.constant 0 : index
    %25 = vector.load %arg9[%c0_16, %c0_17] : memref<256x32xf32, #tpu.memory_space<vmem>>, vector<256x32xf32>
    %c0_18 = arith.constant 0 : index
    %c0_19 = arith.constant 0 : index
    %26 = vector.load %arg9[%c0_18, %c0_19] : memref<256x32xf32, #tpu.memory_space<vmem>>, vector<256x32xf32>
    %27 = arith.subf %24, %26 : vector<256x32xf32>
    %cst_20 = arith.constant 5.000000e-01 : f32
    %28 = vector.broadcast %cst_20 : f32 to vector<256x32xf32>
    %29 = arith.mulf %27, %28 : vector<256x32xf32>
    %30 = arith.addf %25, %29 : vector<256x32xf32>
    %cst_21 = arith.constant 1.000000e+00 : f32
    %31 = vector.broadcast %cst_21 : f32 to vector<256x32xf32>
    %32 = arith.cmpf oge, %30, %31 : vector<256x32xf32>
    %cst_22 = arith.constant 0.000000e+00 : f32
    %33 = vector.broadcast %cst_22 : f32 to vector<256x32xf32>
    %34 = arith.select %32, %33, %30 : vector<256x32xi1>, vector<256x32xf32>
    %c0_23 = arith.constant 0 : index
    %c0_24 = arith.constant 0 : index
    %35 = vector.load %arg9[%c0_23, %c0_24] : memref<256x32xf32, #tpu.memory_space<vmem>>, vector<256x32xf32>
    tpu.vector_store %arg9[%c0_23, %c0_24], %34 {strides = array<i32>} : memref<256x32xf32, #tpu.memory_space<vmem>>, vector<256x32xf32>,
    %36 = arith.extui %32 : vector<256x32xi1> to vector<256x32xi32>
    %37 = arith.sitofp %36 : vector<256x32xi32> to vector<256x32xf32>
    %38 = arith.truncf %37 : vector<256x32xf32> to vector<256x32xbf16>
    %c0_25 = arith.constant 0 : index
    %c0_26 = arith.constant 0 : index
    %39 = vector.load %arg5[%c0_25, %c0_26] : memref<32x16xbf16, #tpu.memory_space<vmem>>, vector<32x16xbf16>
    %cst_27 = arith.constant dense<0.000000e+00> : vector<256x16xf32>
    %40 = tpu.matmul %38, %39, %cst_27 {dimension_numbers = #tpu.dot_dimension_numbers<[1], [0], [0], [1], [0, 0, 1, 1], [], []>} : vector<256x32xbf16>, vector<32x16xbf16>, vector<256x16xf32> -> vector<256x16xf32>
    %c0_28 = arith.constant 0 : index
    %c0_29 = arith.constant 0 : index
    %41 = vector.load %arg6[%c0_28, %c0_29] : memref<1x16xf32, #tpu.memory_space<vmem>>, vector<1x16xf32>
    %42 = vector.broadcast %41 : vector<1x16xf32> to vector<256x16xf32>
    %43 = arith.addf %40, %42 : vector<256x16xf32>
    %44 = arith.truncf %43 : vector<256x16xf32> to vector<256x16xbf16>
    %c0_30 = arith.constant 0 : index
    %c0_31 = arith.constant 0 : index
    %c0_32 = arith.constant 0 : index
    %45 = vector.load %arg7[%c0_30, %c0_31, %c0_32] : memref<1x256x16xbf16, #tpu.memory_space<vmem>>, vector<1x256x16xbf16>
    %46 = vector.shape_cast %45 : vector<1x256x16xbf16> to vector<256x16xbf16>
    %47 = vector.shape_cast %44 : vector<256x16xbf16> to vector<1x256x16xbf16>
    tpu.vector_store %arg7[%c0_30, %c0_31, %c0_32], %47 {strides = array<i32>} : memref<1x256x16xbf16, #tpu.memory_space<vmem>>, vector<1x256x16xbf16>,
    return
  }
  func.func @transform_0(%arg0: i32, %arg1: i32) -> (i32, i32, i32) {
    %c0_i32 = arith.constant 0 : i32
    %c0_i32_0 = arith.constant 0 : i32
    return %arg1, %arg0, %c0_i32 : i32, i32, i32
  }
  func.func @transform_1(%arg0: i32, %arg1: i32) -> (i32, i32) {
    %c0_i32 = arith.constant 0 : i32
    %c0_i32_0 = arith.constant 0 : i32
    %c0_i32_1 = arith.constant 0 : i32
    return %c0_i32, %c0_i32_0 : i32, i32
  }
  func.func @transform_2(%arg0: i32, %arg1: i32) -> (i32, i32) {
    %c0_i32 = arith.constant 0 : i32
    %c0_i32_0 = arith.constant 0 : i32
    %c0_i32_1 = arith.constant 0 : i32
    return %c0_i32, %c0_i32_0 : i32, i32
  }
  func.func @transform_3(%arg0: i32, %arg1: i32) -> (i32, i32) {
    %c0_i32 = arith.constant 0 : i32
    %c0_i32_0 = arith.constant 0 : i32
    %c0_i32_1 = arith.constant 0 : i32
    return %c0_i32, %c0_i32_0 : i32, i32
  }
  func.func @transform_4(%arg0: i32, %arg1: i32) -> (i32, i32) {
    %c0_i32 = arith.constant 0 : i32
    %c0_i32_0 = arith.constant 0 : i32
    %c0_i32_1 = arith.constant 0 : i32
    return %c0_i32, %c0_i32_0 : i32, i32
  }
  func.func @transform_5(%arg0: i32, %arg1: i32) -> (i32, i32, i32) {
    %c0_i32 = arith.constant 0 : i32
    %c0_i32_0 = arith.constant 0 : i32
    return %arg1, %arg0, %c0_i32 : i32, i32, i32
  }
}

</mosaic_0001>

<bundles_post_ra>
// kernel: _lambda_.1
= control target key start
LH: loop header
LB: loop body
LE: loop exit
PB: predicated region body
PF: predicated region fallthrough
CT: control target
= control target key end

     0   :  { %s1793_s18 = smov 0   ;;  %s1795_s19 = smov 0   ;;  %s2449_s0 = inlined_call_operand.vmem [shape: bf16[4,512,16], index: 0, kind: input, shape index: {}]   ;;  %s2450_s1 = inlined_call_operand.vmem [shape: bf16[16,32], index: 1, kind: input, shape index: {}]   ;;  %s2451_s2 = inlined_call_operand.vmem [shape: f32[1,32], index: 2, kind: input, shape index: {}]   ;;  %s2452_s3 = inlined_call_operand.vmem [shape: bf16[32,16], index: 3, kind: input, shape index: {}]   ;;  %s2453_s4 = inlined_call_operand.vmem [shape: f32[1,16], index: 4, kind: input, shape index: {}]   ;;  %s2454_s5 = inlined_call_operand.vmem [shape: bf16[4,512,16], index: 5, kind: output, shape index: {}]  }
   0x1   :  { %s1797_s20 = smov 0   ;;  %s1799_s21 = smov 0  }
   0x2   :  { %s1801_s22 = smov 0  }
   0x3 LB: > { %s24_s23 = sadd.s32 1, %s1751_s20  ;;  %s27_s24 = sadd.s32 1, %s1755_s21  ;;  %s1759_s22 = sphi %s1801_s22, %s15_s22   ;;  %s1755_s21 = sphi %s1799_s21, %s2458_s21   ;;  %s1751_s20 = sphi %s1797_s20, %s2457_s20   ;;  %s1747_s19 = sphi %s1795_s19, %s2456_s19   ;;  %s1743_s18 = sphi %s1793_s18, %s2455_s18  }
   0x4   : > { %p25_p0 = scmp.ge.s32.totalorder %s24_s23, 4  ;;  %p1474_p1 = scmp.ge.s32.totalorder %s1759_s22, 1 }
   0x5   : > { %p208_p2 = scmp.lt.s32.totalorder %s1759_s22, 9 }
   0x6   : > { %s2460_s23 = smov (%p25_p0, %s24_s23), 0  ;;  %s2462_s24 = smov (!%p25_p0, %s27_s24), %s1755_s21 }
   0x7   : > { %p209_p3 = pnand %p1474_p1, %p208_p2  ;;  %p29_p4 = scmp.ge.s32.totalorder %s2462_s24, 2 }
   0x8   : > { %s1475_s25 = sshll.u32 (!%p209_p3), %s1747_s19, 5  ;;  %p245_p5 = scmp.lt.s32.totalorder (!%p209_p3), %s1743_s18, 3 }
   0x9   : > { %s2464_s24 = smov (%p29_p4, %s2462_s24), 0  ;;  %212 = sbr.rel (%p209_p3) target bundleno = 630 (0x276), region = 40 }
   0xa   : > { %p247_p6 = scmp.lt.s32.totalorder (!%p209_p3), %s1475_s25, 63  ;;  %p1481_p7 = scmp.ne.s32.totalorder (!%p209_p3), %s1743_s18, 0 }
   0xe   : > { %s246_s26 = scalar_select %p245_p5, %s1743_s18, 3 }
   0xf   : > { %s2466_s25 = smov (!%p247_p6, %s1475_s25), 63  ;;  %268 = sbr.rel (%p1481_p7) target bundleno = 85 (0x55), region = 44 }
  0x10   : > { %s1476_s27 = sshll.u32 %s246_s26, 6 }
  0x11   : > { %s250_s28 = sadd.s32 %s1476_s27, %s2466_s25 }
  0x12   : > { %s1477_s29 = sshll.u32 %s250_s28, 2 }
  0x13   : > { %s1826_s7 = scalar_lea.vmem %s2449_s0, %s1477_s29  ;;  %s1831_s10 = scalar_lea.vmem %s2454_s5, %s1477_s29 }
  0x14   : > { %vm269_vm0 = vcmask 130048   ;;  %v1761_v0 = vmov 0.0   ;;  %vm302_vm1 = vcmask 261120  }
  0x15   : > { %270 = vst.msk [vmem:[#allocation2] sm:$0xff] %vm269_vm0, %v1761_v0 }
  0x16   : > { %271 = vst.msk [vmem:[#allocation2 + $0x8] sm:$0xff] %vm269_vm0, %v1761_v0 }
  0x17   : > { %272 = vst.msk [vmem:[#allocation2 + $0x10] sm:$0xff] %vm269_vm0, %v1761_v0 }
  0x18   : > { %273 = vst.msk [vmem:[#allocation2 + $0x18] sm:$0xff] %vm269_vm0, %v1761_v0 }
  0x19   : > { %274 = vst.msk [vmem:[#allocation2 + $0x20] sm:$0xff] %vm269_vm0, %v1761_v0 }
  0x1a   : > { %275 = vst.msk [vmem:[#allocation2 + $0x28] sm:$0xff] %vm269_vm0, %v1761_v0 }
  0x1b   : > { %276 = vst.msk [vmem:[#allocation2 + $0x30] sm:$0xff] %vm269_vm0, %v1761_v0 }
  0x1c   : > { %277 = vst.msk [vmem:[#allocation2 + $0x38] sm:$0xff] %vm269_vm0, %v1761_v0 }
  0x1d   : > { %278 = vst.msk [vmem:[#allocation2 + $0x40] sm:$0xff] %vm269_vm0, %v1761_v0 }
  0x1e   : > { %279 = vst.msk [vmem:[#allocation2 + $0x48] sm:$0xff] %vm269_vm0, %v1761_v0 }
  0x1f   : > { %280 = vst.msk [vmem:[#allocation2 + $0x50] sm:$0xff] %vm269_vm0, %v1761_v0 }
  0x20   : > { %281 = vst.msk [vmem:[#allocation2 + $0x58] sm:$0xff] %vm269_vm0, %v1761_v0 }
  0x21   : > { %282 = vst.msk [vmem:[#allocation2 + $0x60] sm:$0xff] %vm269_vm0, %v1761_v0 }
  0x22   : > { %283 = vst.msk [vmem:[#allocation2 + $0x68] sm:$0xff] %vm269_vm0, %v1761_v0 }
  0x23   : > { %284 = vst.msk [vmem:[#allocation2 + $0x70] sm:$0xff] %vm269_vm0, %v1761_v0 }
  0x24   : > { %285 = vst.msk [vmem:[#allocation2 + $0x78] sm:$0xff] %vm269_vm0, %v1761_v0 }
  0x25   : > { %286 = vst.msk [vmem:[#allocation2 + $0x80] sm:$0xff] %vm269_vm0, %v1761_v0 }
  0x26   : > { %287 = vst.msk [vmem:[#allocation2 + $0x88] sm:$0xff] %vm269_vm0, %v1761_v0 }
  0x27   : > { %288 = vst.msk [vmem:[#allocation2 + $0x90] sm:$0xff] %vm269_vm0, %v1761_v0 }
  0x28   : > { %289 = vst.msk [vmem:[#allocation2 + $0x98] sm:$0xff] %vm269_vm0, %v1761_v0 }
  0x29   : > { %290 = vst.msk [vmem:[#allocation2 + $0xa0] sm:$0xff] %vm269_vm0, %v1761_v0 }
  0x2a   : > { %291 = vst.msk [vmem:[#allocation2 + $0xa8] sm:$0xff] %vm269_vm0, %v1761_v0 }
  0x2b   : > { %292 = vst.msk [vmem:[#allocation2 + $0xb0] sm:$0xff] %vm269_vm0, %v1761_v0 }
  0x2c   : > { %293 = vst.msk [vmem:[#allocation2 + $0xb8] sm:$0xff] %vm269_vm0, %v1761_v0 }
  0x2d   : > { %294 = vst.msk [vmem:[#allocation2 + $0xc0] sm:$0xff] %vm269_vm0, %v1761_v0 }
  0x2e   : > { %295 = vst.msk [vmem:[#allocation2 + $0xc8] sm:$0xff] %vm269_vm0, %v1761_v0 }
  0x2f   : > { %296 = vst.msk [vmem:[#allocation2 + $0xd0] sm:$0xff] %vm269_vm0, %v1761_v0 }
  0x30   : > { %297 = vst.msk [vmem:[#allocation2 + $0xd8] sm:$0xff] %vm269_vm0, %v1761_v0 }
  0x31   : > { %298 = vst.msk [vmem:[#allocation2 + $0xe0] sm:$0xff] %vm269_vm0, %v1761_v0 }
  0x32   : > { %299 = vst.msk [vmem:[#allocation2 + $0xe8] sm:$0xff] %vm269_vm0, %v1761_v0 }
  0x33   : > { %300 = vst.msk [vmem:[#allocation2 + $0xf0] sm:$0xff] %vm269_vm0, %v1761_v0 }
  0x34   : > { %301 = vst.msk [vmem:[#allocation2 + $0xf8] sm:$0xff] %vm269_vm0, %v1761_v0 }
  0x35   : > { %303 = vst.msk [vmem:[#allocation3] sm:$0xff] %vm302_vm1, %v1761_v0 }
  0x36   : > { %304 = vst.msk [vmem:[#allocation3 + $0x8] sm:$0xff] %vm302_vm1, %v1761_v0 }
  0x37   : > { %305 = vst.msk [vmem:[#allocation3 + $0x10] sm:$0xff] %vm302_vm1, %v1761_v0 }
  0x38   : > { %306 = vst.msk [vmem:[#allocation3 + $0x18] sm:$0xff] %vm302_vm1, %v1761_v0 }
  0x39   : > { %307 = vst.msk [vmem:[#allocation3 + $0x20] sm:$0xff] %vm302_vm1, %v1761_v0 }
  0x3a   : > { %308 = vst.msk [vmem:[#allocation3 + $0x28] sm:$0xff] %vm302_vm1, %v1761_v0 }
  0x3b   : > { %309 = vst.msk [vmem:[#allocation3 + $0x30] sm:$0xff] %vm302_vm1, %v1761_v0 }
  0x3c   : > { %310 = vst.msk [vmem:[#allocation3 + $0x38] sm:$0xff] %vm302_vm1, %v1761_v0 }
  0x3d   : > { %311 = vst.msk [vmem:[#allocation3 + $0x40] sm:$0xff] %vm302_vm1, %v1761_v0 }
  0x3e   : > { %312 = vst.msk [vmem:[#allocation3 + $0x48] sm:$0xff] %vm302_vm1, %v1761_v0 }
  0x3f   : > { %313 = vst.msk [vmem:[#allocation3 + $0x50] sm:$0xff] %vm302_vm1, %v1761_v0 }
  0x40   : > { %314 = vst.msk [vmem:[#allocation3 + $0x58] sm:$0xff] %vm302_vm1, %v1761_v0 }
  0x41   : > { %315 = vst.msk [vmem:[#allocation3 + $0x60] sm:$0xff] %vm302_vm1, %v1761_v0 }
  0x42   : > { %316 = vst.msk [vmem:[#allocation3 + $0x68] sm:$0xff] %vm302_vm1, %v1761_v0 }
  0x43   : > { %317 = vst.msk [vmem:[#allocation3 + $0x70] sm:$0xff] %vm302_vm1, %v1761_v0 }
  0x44   : > { %318 = vst.msk [vmem:[#allocation3 + $0x78] sm:$0xff] %vm302_vm1, %v1761_v0 }
  0x45   : > { %319 = vst.msk [vmem:[#allocation3 + $0x80] sm:$0xff] %vm302_vm1, %v1761_v0 }
  0x46   : > { %320 = vst.msk [vmem:[#allocation3 + $0x88] sm:$0xff] %vm302_vm1, %v1761_v0 }
  0x47   : > { %321 = vst.msk [vmem:[#allocation3 + $0x90] sm:$0xff] %vm302_vm1, %v1761_v0 }
  0x48   : > { %322 = vst.msk [vmem:[#allocation3 + $0x98] sm:$0xff] %vm302_vm1, %v1761_v0 }
  0x49   : > { %323 = vst.msk [vmem:[#allocation3 + $0xa0] sm:$0xff] %vm302_vm1, %v1761_v0 }
  0x4a   : > { %324 = vst.msk [vmem:[#allocation3 + $0xa8] sm:$0xff] %vm302_vm1, %v1761_v0 }
  0x4b   : > { %325 = vst.msk [vmem:[#allocation3 + $0xb0] sm:$0xff] %vm302_vm1, %v1761_v0 }
  0x4c   : > { %326 = vst.msk [vmem:[#allocation3 + $0xb8] sm:$0xff] %vm302_vm1, %v1761_v0 }
  0x4d   : > { %327 = vst.msk [vmem:[#allocation3 + $0xc0] sm:$0xff] %vm302_vm1, %v1761_v0 }
  0x4e   : > { %328 = vst.msk [vmem:[#allocation3 + $0xc8] sm:$0xff] %vm302_vm1, %v1761_v0 }
  0x4f   : > { %329 = vst.msk [vmem:[#allocation3 + $0xd0] sm:$0xff] %vm302_vm1, %v1761_v0 }
  0x50   : > { %330 = vst.msk [vmem:[#allocation3 + $0xd8] sm:$0xff] %vm302_vm1, %v1761_v0 }
  0x51   : > { %331 = vst.msk [vmem:[#allocation3 + $0xe0] sm:$0xff] %vm302_vm1, %v1761_v0 }
  0x52   : > { %332 = vst.msk [vmem:[#allocation3 + $0xe8] sm:$0xff] %vm302_vm1, %v1761_v0 }
  0x53   : > { %333 = vst.msk [vmem:[#allocation3 + $0xf0] sm:$0xff] %vm302_vm1, %v1761_v0 }
  0x54   : > { %334 = vst.msk [vmem:[#allocation3 + $0xf8] sm:$0xff] %vm302_vm1, %v1761_v0 }
  0x55 PF: > { %v1592_v1 = vld [vmem:[%s2450_s1] sm:$0xff]  ;;  %v400_v6 = vld [vmem:[#allocation2 + $0x8] sm:$0xff]  ;;  %v401_v8 = vld [vmem:[#allocation2 + $0x10] sm:$0xff]  ;;  %vm591_vm2 = vcmask 130048   ;;  %v1762_v37 = vmov 0.0  }
  0x56   : > { %v1596_v2 = vld [vmem:[%s1826_s7] sm:$0xff]   ;;  %v1659_v7 = vld [vmem:[%s1826_s7 + $0x8] sm:$0xff]   ;;  %771 = vmatpush.bf16.msra.mxu0 %v1592_v1  ;;  %v402_v11 = vld [vmem:[#allocation2 + $0x18] sm:$0xff]  ;;  %1674 = vmatpush.bf16.msra.mxu3 %v1592_v1 }
  0x57   : > { %v399_v3 = vld [vmem:[#allocation2] sm:$0xff]  ;;  %v1597_v4 = vunpack.c.l.bf16 %v1596_v2  ;;  %v1598_v5 = vunpack.c.h.bf16 %v1596_v2  ;;  %v1601_v9 = vunpack.c.l.bf16 %v1659_v7  ;;  %v1602_v10 = vunpack.c.h.bf16 %v1659_v7  ;;  %v1660_v12 = vld [vmem:[%s1826_s7 + $0x10] sm:$0xff]   ;;  %v404_v18 = vld [vmem:[#allocation2 + $0x28] sm:$0xff] }
  0x58   : > { %v403_v13 = vld [vmem:[#allocation2 + $0x20] sm:$0xff]  ;;  %v1605_v16 = vunpack.c.l.bf16 %v1660_v12  ;;  %v1606_v17 = vunpack.c.h.bf16 %v1660_v12  ;;  %v1661_v44 = vld [vmem:[%s1826_s7 + $0x18] sm:$0xff]   ;;  %v405_v45 = vld [vmem:[#allocation2 + $0x30] sm:$0xff] }
  0x59   : > { %v431_v14 = vsub.f32 %v1597_v4, %v399_v3  ;;  %v432_v15 = vsub.f32 %v1598_v5, %v400_v6  ;;  %v433_v19 = vsub.f32 %v1601_v9, %v401_v8  ;;  %v434_v20 = vsub.f32 %v1602_v10, %v402_v11  ;;  %v406_v49 = vld [vmem:[#allocation2 + $0x38] sm:$0xff]  ;;  %v1662_v61 = vld [vmem:[%s1826_s7 + $0x20] sm:$0xff]   ;;  %v408_v63 = vld [vmem:[#allocation2 + $0x48] sm:$0xff] }
  0x5a   : > { %v435_v23 = vsub.f32 %v1605_v16, %v403_v13  ;;  %v436_v24 = vsub.f32 %v1606_v17, %v404_v18  ;;  %v1609_v47 = vunpack.c.l.bf16 %v1661_v44  ;;  %v1610_v48 = vunpack.c.h.bf16 %v1661_v44  ;;  %v407_v62 = vld [vmem:[#allocation2 + $0x40] sm:$0xff] }
  0x5b   : > { %v463_v21 = vmul.f32 0.5, %v431_v14  ;;  %v464_v22 = vmul.f32 0.5, %v432_v15  ;;  %v465_v25 = vmul.f32 0.5, %v433_v19  ;;  %v466_v26 = vmul.f32 0.5, %v434_v20  ;;  %v409_v14 = vld [vmem:[#allocation2 + $0x50] sm:$0xff]  ;;  %v410_v15 = vld [vmem:[#allocation2 + $0x58] sm:$0xff] }
  0x5c   : > { %v467_v29 = vmul.f32 0.5, %v435_v23  ;;  %v468_v30 = vmul.f32 0.5, %v436_v24  ;;  %v437_v50 = vsub.f32 %v1609_v47, %v405_v45  ;;  %v438_v51 = vsub.f32 %v1610_v48, %v406_v49  ;;  %v413_v47 = vld [vmem:[#allocation2 + $0x70] sm:$0xff]  ;;  %v414_v48 = vld [vmem:[#allocation2 + $0x78] sm:$0xff] }
  0x5d   : > { %v495_v27 = vadd.f32 %v463_v21, %v399_v3  ;;  %v496_v28 = vadd.f32 %v464_v22, %v400_v6  ;;  %v497_v31 = vadd.f32 %v465_v25, %v401_v8  ;;  %v498_v32 = vadd.f32 %v466_v26, %v402_v11 }
  0x5e   : > { %v499_v33 = vadd.f32 %v467_v29, %v403_v13  ;;  %v500_v34 = vadd.f32 %v468_v30, %v404_v18  ;;  %v469_v52 = vmul.f32 0.5, %v437_v50  ;;  %v470_v53 = vmul.f32 0.5, %v438_v51  ;;  %v1663_v13 = vld [vmem:[%s1826_s7 + $0x28] sm:$0xff]   ;;  %v1664_v29 = vld [vmem:[%s1826_s7 + $0x30] sm:$0xff]   ;;  %v411_v30 = vld [vmem:[#allocation2 + $0x60] sm:$0xff] }
  0x5f   : > { %vm527_vm3 = vcmp.ge.f32.partialorder %v495_v27, 1.0  ;;  %vm528_vm4 = vcmp.ge.f32.partialorder %v496_v28, 1.0  ;;  %vm529_vm5 = vcmp.ge.f32.partialorder %v497_v31, 1.0  ;;  %vm530_vm6 = vcmp.ge.f32.partialorder %v498_v32, 1.0 }
  0x60   : > { %v559_v35 = vsel %vm527_vm3, 0.0, %v495_v27  ;;  %v560_v36 = vsel %vm528_vm4, 0.0, %v496_v28  ;;  %v1482_v38 = vsel %vm527_vm3, 1.0, %v1762_v37  ;;  %v1483_v39 = vsel %vm528_vm4, 1.0, %v1762_v37 }
  0x61   : > { %592 = vst.msk [vmem:[#allocation2] sm:$0xff] %vm591_vm2, %v559_v35  ;;  %v688_v40 = vpack.c.bf16 %v1483_v39, %v1482_v38  ;;  %v561_v41 = vsel %vm529_vm5, 0.0, %v497_v31  ;;  %v562_v42 = vsel %vm530_vm6, 0.0, %v498_v32  ;;  %vm531_vm7 = vcmp.ge.f32.partialorder %v499_v33, 1.0  ;;  %v412_v31 = vld [vmem:[#allocation2 + $0x68] sm:$0xff] }
  0x62   : > { %593 = vst.msk [vmem:[#allocation2 + $0x8] sm:$0xff] %vm591_vm2, %v560_v36  ;;  %vm532_vm8 = vcmp.ge.f32.partialorder %v500_v34, 1.0  ;;  %v563_v43 = vsel %vm531_vm7, 0.0, %v499_v33  ;;  %v501_v54 = vadd.f32 %v469_v52, %v405_v45  ;;  %v502_v55 = vadd.f32 %v470_v53, %v406_v49 }
  0x63   : > { %1518 = vmatmul.msk.bf16.vlgmr.msra.gmra.mxu0 %vm591_vm2, %v688_v40  ;;  %594 = vst.msk [vmem:[#allocation2 + $0x10] sm:$0xff] %vm591_vm2, %v561_v41  ;;  %v564_v46 = vsel %vm532_vm8, 0.0, %v500_v34  ;;  %v1484_v56 = vsel %vm529_vm5, 1.0, %v1762_v37  ;;  %v1485_v57 = vsel %vm530_vm6, 1.0, %v1762_v37  ;;  %v1613_v0 = vunpack.c.l.bf16 %v1662_v61 }
  0x64   : > { %595 = vst.msk [vmem:[#allocation2 + $0x18] sm:$0xff] %vm591_vm2, %v562_v42  ;;  %vm533_vm9 = vcmp.ge.f32.partialorder %v501_v54, 1.0  ;;  %vm534_vm10 = vcmp.ge.f32.partialorder %v502_v55, 1.0  ;;  %v689_v60 = vpack.c.bf16 %v1485_v57, %v1484_v56  ;;  %v1614_v1 = vunpack.c.h.bf16 %v1662_v61 }
  0x65   : > { %596 = vst.msk [vmem:[#allocation2 + $0x20] sm:$0xff] %vm591_vm2, %v563_v43  ;;  %v565_v58 = vsel %vm533_vm9, 0.0, %v501_v54  ;;  %v566_v59 = vsel %vm534_vm10, 0.0, %v502_v55  ;;  %v439_v2 = vsub.f32 %v1613_v0, %v407_v62  ;;  %v1486_v8 = vsel %vm531_vm7, 1.0, %v1762_v37 }
  0x66   : > { %597 = vst.msk [vmem:[#allocation2 + $0x28] sm:$0xff] %vm591_vm2, %v564_v46  ;;  %v440_v3 = vsub.f32 %v1614_v1, %v408_v63  ;;  %v1487_v9 = vsel %vm532_vm8, 1.0, %v1762_v37  ;;  %v1617_v16 = vunpack.c.l.bf16 %v1663_v13  ;;  %v1618_v17 = vunpack.c.h.bf16 %v1663_v13  ;;  %v1665_v46 = vld [vmem:[%s1826_s7 + $0x38] sm:$0xff]   ;;  %v1667_v1 = vld [vmem:[%s1826_s7 + $0x48] sm:$0xff]  }
  0x67   : > { %598 = vst.msk [vmem:[#allocation2 + $0x30] sm:$0xff] %vm591_vm2, %v565_v58  ;;  %v471_v4 = vmul.f32 0.5, %v439_v2  ;;  %v690_v12 = vpack.c.bf16 %v1487_v9, %v1486_v8  ;;  %v1488_v24 = vsel %vm533_vm9, 1.0, %v1762_v37  ;;  %v1489_v25 = vsel %vm534_vm10, 1.0, %v1762_v37  ;;  %v415_v2 = vld [vmem:[#allocation2 + $0x80] sm:$0xff] }
  0x68   : > { %599 = vst.msk [vmem:[#allocation2 + $0x38] sm:$0xff] %vm591_vm2, %v566_v59  ;;  %v472_v5 = vmul.f32 0.5, %v440_v3  ;;  %v441_v18 = vsub.f32 %v1617_v16, %v409_v14  ;;  %v442_v19 = vsub.f32 %v1618_v17, %v410_v15  ;;  %v691_v28 = vpack.c.bf16 %v1489_v25, %v1488_v24  ;;  %v416_v3 = vld [vmem:[#allocation2 + $0x88] sm:$0xff] }
  0x69   : > { %v503_v6 = vadd.f32 %v471_v4, %v407_v62  ;;  %v1621_v32 = vunpack.c.l.bf16 %v1664_v29  ;;  %v1622_v33 = vunpack.c.h.bf16 %v1664_v29  ;;  %v1625_v49 = vunpack.c.l.bf16 %v1665_v46  ;;  %v1666_v62 = vld [vmem:[%s1826_s7 + $0x40] sm:$0xff]   ;;  %v1668_v29 = vld [vmem:[%s1826_s7 + $0x50] sm:$0xff]  }
  0x6a   : > { %v504_v7 = vadd.f32 %v472_v5, %v408_v63  ;;  %v473_v20 = vmul.f32 0.5, %v441_v18  ;;  %v474_v21 = vmul.f32 0.5, %v442_v19  ;;  %v1626_v50 = vunpack.c.h.bf16 %v1665_v46  ;;  %v1593_v46 = vld [vmem:[%s2452_s3] sm:$0xff] }
  0x6b   : > { %vm535_vm11 = vcmp.ge.f32.partialorder %v503_v6, 1.0  ;;  %v443_v34 = vsub.f32 %v1621_v32, %v411_v30  ;;  %v444_v35 = vsub.f32 %v1622_v33, %v412_v31  ;;  %v445_v51 = vsub.f32 %v1625_v49, %v413_v47  ;;  %v419_v33 = vld [vmem:[#allocation2 + $0xa0] sm:$0xff] }
  0x6c   : > { %vm536_vm12 = vcmp.ge.f32.partialorder %v504_v7, 1.0  ;;  %v567_v10 = vsel %vm535_vm11, 0.0, %v503_v6  ;;  %v505_v22 = vadd.f32 %v473_v20, %v409_v14  ;;  %v506_v23 = vadd.f32 %v474_v21, %v410_v15  ;;  %v417_v6 = vld [vmem:[#allocation2 + $0x90] sm:$0xff] }
  0x6d   : > { %v568_v11 = vsel %vm536_vm12, 0.0, %v504_v7  ;;  %600 = vst.msk [vmem:[#allocation2 + $0x40] sm:$0xff] %vm591_vm2, %v567_v10  ;;  %v475_v36 = vmul.f32 0.5, %v443_v34  ;;  %v476_v38 = vmul.f32 0.5, %v444_v35  ;;  %v1490_v41 = vsel %vm535_vm11, 1.0, %v1762_v37  ;;  %v418_v7 = vld [vmem:[#allocation2 + $0x98] sm:$0xff] }
  0x6e   : > { %601 = vst.msk [vmem:[#allocation2 + $0x48] sm:$0xff] %vm591_vm2, %v568_v11  ;;  %vm537_vm13 = vcmp.ge.f32.partialorder %v505_v22, 1.0  ;;  %vm538_vm14 = vcmp.ge.f32.partialorder %v506_v23, 1.0  ;;  %v1491_v42 = vsel %vm536_vm12, 1.0, %v1762_v37  ;;  %v446_v52 = vsub.f32 %v1626_v50, %v414_v48  ;;  %v420_v34 = vld [vmem:[#allocation2 + $0xa8] sm:$0xff] }
  0x6f   : > { %v569_v26 = vsel %vm537_vm13, 0.0, %v505_v22  ;;  %v570_v27 = vsel %vm538_vm14, 0.0, %v506_v23  ;;  %v507_v39 = vadd.f32 %v475_v36, %v411_v30  ;;  %v508_v40 = vadd.f32 %v476_v38, %v412_v31 }
  0x70   : > { %602 = vst.msk [vmem:[#allocation2 + $0x50] sm:$0xff] %vm591_vm2, %v569_v26  ;;  %v692_v45 = vpack.c.bf16 %v1491_v42, %v1490_v41  ;;  %v477_v53 = vmul.f32 0.5, %v445_v51  ;;  %v478_v54 = vmul.f32 0.5, %v446_v52  ;;  %v1492_v57 = vsel %vm537_vm13, 1.0, %v1762_v37  ;;  %v1669_v52 = vld [vmem:[%s1826_s7 + $0x58] sm:$0xff]  }
  0x71   : > { %603 = vst.msk [vmem:[#allocation2 + $0x58] sm:$0xff] %vm591_vm2, %v570_v27  ;;  %vm539_vm15 = vcmp.ge.f32.partialorder %v507_v39, 1.0  ;;  %vm540_vm0 = vcmp.ge.f32.partialorder %v508_v40, 1.0  ;;  %v1493_v58 = vsel %vm538_vm14, 1.0, %v1762_v37  ;;  %v1629_v63 = vunpack.c.l.bf16 %v1666_v62 }
  0x72   : > { %v571_v43 = vsel %vm539_vm15, 0.0, %v507_v39  ;;  %v572_v44 = vsel %vm540_vm0, 0.0, %v508_v40  ;;  %v509_v55 = vadd.f32 %v477_v53, %v413_v47  ;;  %v510_v56 = vadd.f32 %v478_v54, %v414_v48  ;;  %v1594_v40 = vld [vmem:[%s2452_s3 + $0x8] sm:$0xff] }
  0x73   : > { %1519 = vmatmul.msk.bf16.gmra.mxu0 %vm591_vm2, %v689_v60  ;;  %604 = vst.msk [vmem:[#allocation2 + $0x60] sm:$0xff] %vm591_vm2, %v571_v43  ;;  %v693_v61 = vpack.c.bf16 %v1493_v58, %v1492_v57  ;;  %v1630_v0 = vunpack.c.h.bf16 %v1666_v62  ;;  %v1633_v4 = vunpack.c.l.bf16 %v1667_v1  ;;  %v1634_v5 = vunpack.c.h.bf16 %v1667_v1  ;;  %1232 = vmatpush.bf16.msra.mxu1 %v1594_v40 }
  0x74   : > { %605 = vst.msk [vmem:[#allocation2 + $0x68] sm:$0xff] %vm591_vm2, %v572_v44  ;;  %vm541_vm1 = vcmp.ge.f32.partialorder %v509_v55, 1.0  ;;  %vm542_vm3 = vcmp.ge.f32.partialorder %v510_v56, 1.0  ;;  %v447_v8 = vsub.f32 %v1629_v63, %v415_v2  ;;  %v1495_v13 = vsel %vm540_vm0, 1.0, %v1762_v37  ;;  %1675 = vmatpush.bf16.msra.mxu2 %v1594_v40  ;;  %v2071_v63 = vld [vmem:[%s2451_s2] ss:$0 sm:$0xff] }
  0x75   : > { %v573_v59 = vsel %vm541_vm1, 0.0, %v509_v55  ;;  %v574_v60 = vsel %vm542_vm3, 0.0, %v510_v56  ;;  %v448_v9 = vsub.f32 %v1630_v0, %v416_v3  ;;  %v449_v10 = vsub.f32 %v1633_v4, %v417_v6  ;;  %v421_v55 = vld [vmem:[#allocation2 + $0xb0] sm:$0xff]  ;;  %v422_v56 = vld [vmem:[#allocation2 + $0xb8] sm:$0xff]  ;;  %v853_v4 = vld [vmem:[#allocation3] sm:$0xff] }
  0x76   : > { %606 = vst.msk [vmem:[#allocation2 + $0x70] sm:$0xff] %vm591_vm2, %v573_v59  ;;  %v450_v11 = vsub.f32 %v1634_v5, %v418_v7  ;;  %v479_v16 = vmul.f32 0.5, %v447_v8  ;;  %v1637_v31 = vunpack.c.l.bf16 %v1668_v29  ;;  %v1638_v32 = vunpack.c.h.bf16 %v1668_v29 }
  0x77   : > { %607 = vst.msk [vmem:[#allocation2 + $0x78] sm:$0xff] %vm591_vm2, %v574_v60  ;;  %v481_v14 = vmul.f32 0.5, %v449_v10  ;;  %v480_v17 = vmul.f32 0.5, %v448_v9  ;;  %v1496_v38 = vsel %vm541_vm1, 1.0, %v1762_v37  ;;  %v1497_v39 = vsel %vm542_vm3, 1.0, %v1762_v37  ;;  %1233 = vmatpush.bf16.msra.mxu1 %v1593_v46 }
  0x78   : > { %v482_v15 = vmul.f32 0.5, %v450_v11  ;;  %v511_v23 = vadd.f32 %v479_v16, %v415_v2  ;;  %v451_v35 = vsub.f32 %v1637_v31, %v419_v33  ;;  %v452_v36 = vsub.f32 %v1638_v32, %v420_v34  ;;  %1676 = vmatpush.bf16.msra.mxu2 %v1593_v46  ;;  %v854_v16 = vld [vmem:[#allocation3 + $0x8] sm:$0xff] }
  0x79   : > { %v513_v18 = vadd.f32 %v481_v14, %v417_v6  ;;  %v512_v24 = vadd.f32 %v480_v17, %v416_v3  ;;  %v1641_v53 = vunpack.c.l.bf16 %v1669_v52  ;;  %v1642_v54 = vunpack.c.h.bf16 %v1669_v52  ;;  %v1670_v14 = vld [vmem:[%s1826_s7 + $0x60] sm:$0xff]  }
  0x7a   : > { %v514_v19 = vadd.f32 %v482_v15, %v418_v7  ;;  %vm543_vm6 = vcmp.ge.f32.partialorder %v511_v23, 1.0  ;;  %v483_v41 = vmul.f32 0.5, %v451_v35  ;;  %v484_v42 = vmul.f32 0.5, %v452_v36 }
  0x7b   : > { %vm545_vm4 = vcmp.ge.f32.partialorder %v513_v18, 1.0  ;;  %vm544_vm7 = vcmp.ge.f32.partialorder %v512_v24, 1.0  ;;  %v575_v26 = vsel %vm543_vm6, 0.0, %v511_v23  ;;  %v453_v57 = vsub.f32 %v1641_v53, %v421_v55 }
  0x7c   : > { %vm546_vm5 = vcmp.ge.f32.partialorder %v514_v19, 1.0  ;;  %v1500_v21 = vsel %vm545_vm4, 1.0, %v1762_v37  ;;  %v576_v27 = vsel %vm544_vm7, 0.0, %v512_v24  ;;  %608 = vst.msk [vmem:[#allocation2 + $0x80] sm:$0xff] %vm591_vm2, %v575_v26  ;;  %v515_v43 = vadd.f32 %v483_v41, %v419_v33  ;;  %v855_v33 = vld [vmem:[#allocation3 + $0x10] sm:$0xff] }
  0x7d   : > { %v1501_v22 = vsel %vm546_vm5, 1.0, %v1762_v37  ;;  %v578_v30 = vsel %vm546_vm5, 0.0, %v514_v19  ;;  %609 = vst.msk [vmem:[#allocation2 + $0x88] sm:$0xff] %vm591_vm2, %v576_v27  ;;  %v516_v44 = vadd.f32 %v484_v42, %v420_v34  ;;  %v454_v58 = vsub.f32 %v1642_v54, %v422_v56  ;;  %v425_v54 = vld [vmem:[#allocation2 + $0xd0] sm:$0xff] }
  0x7e   : > { %v697_v25 = vpack.c.bf16 %v1501_v22, %v1500_v21  ;;  %611 = vst.msk [vmem:[#allocation2 + $0x98] sm:$0xff] %vm591_vm2, %v578_v30  ;;  %vm547_vm8 = vcmp.ge.f32.partialorder %v515_v43, 1.0  ;;  %v1498_v59 = vsel %vm543_vm6, 1.0, %v1762_v37  ;;  %v1499_v60 = vsel %vm544_vm7, 1.0, %v1762_v37  ;;  %v424_v21 = vld [vmem:[#allocation2 + $0xc8] sm:$0xff] }
  0x7f   : > { %vm548_vm9 = vcmp.ge.f32.partialorder %v516_v44, 1.0  ;;  %v1502_v47 = vsel %vm547_vm8, 1.0, %v1762_v37  ;;  %v579_v50 = vsel %vm547_vm8, 0.0, %v515_v43  ;;  %v486_v62 = vmul.f32 0.5, %v454_v58 }
  0x80   : > { %1527 = vmatmul.msk.bf16.vlgmr.msra.gmra.mxu3 %vm591_vm2, %v697_v25  ;;  %v1503_v48 = vsel %vm548_vm9, 1.0, %v1762_v37  ;;  %v580_v51 = vsel %vm548_vm9, 0.0, %v516_v44  ;;  %612 = vst.msk [vmem:[#allocation2 + $0xa0] sm:$0xff] %vm591_vm2, %v579_v50  ;;  %v696_v2 = vpack.c.bf16 %v1499_v60, %v1498_v59  ;;  %vm1045_vm12 = vcmask 261120   ;;  %v856_v50 = vld [vmem:[#allocation3 + $0x18] sm:$0xff] }
  0x81   : > { %v698_v49 = vpack.c.bf16 %v1503_v48, %v1502_v47  ;;  %613 = vst.msk [vmem:[#allocation2 + $0xa8] sm:$0xff] %vm591_vm2, %v580_v51  ;;  %v518_v1 = vadd.f32 %v486_v62, %v422_v56  ;;  %v1645_v17 = vunpack.c.l.bf16 %v1670_v14  ;;  %v1671_v48 = vld [vmem:[%s1826_s7 + $0x68] sm:$0xff]  }
  0x82   : > { %v1649_v51 = vunpack.c.l.bf16 %v1671_v48  ;;  %v1650_v52 = vunpack.c.h.bf16 %v1671_v48 }
  0x83   : > { %1520 = vmatmul.msk.bf16.gmra.mxu0 %vm591_vm2, %v690_v12  ;;  %v1494_v12 = vsel %vm539_vm15, 1.0, %v1762_v37  ;;  %vm550_vm11 = vcmp.ge.f32.partialorder %v518_v1, 1.0 }
  0x84   : > { %v694_v20 = vpack.c.bf16 %v1495_v13, %v1494_v12  ;;  %v1505_v7 = vsel %vm550_vm11, 1.0, %v1762_v37  ;;  %v582_v13 = vsel %vm550_vm11, 0.0, %v518_v1 }
  0x85   : > { %615 = vst.msk [vmem:[#allocation2 + $0xb8] sm:$0xff] %vm591_vm2, %v582_v13 }
  0x90   : > { %1528 = vmatmul.msk.bf16.gmra.mxu3 %vm591_vm2, %v698_v49 }
  0x93   : > { %1521 = vmatmul.msk.bf16.gmra.mxu0 %vm591_vm2, %v691_v28  ;;  %v577_v28 = vsel %vm545_vm4, 0.0, %v513_v18  ;;  %v1646_v18 = vunpack.c.h.bf16 %v1670_v14 }
  0x94   : > { %610 = vst.msk [vmem:[#allocation2 + $0x90] sm:$0xff] %vm591_vm2, %v577_v28 }
  0x95   : > { %v456_v24 = vsub.f32 %v1646_v18, %v424_v21  ;;  %v1672_v18 = vld [vmem:[%s1826_s7 + $0x70] sm:$0xff]  }
  0x97   : > { %v488_v27 = vmul.f32 0.5, %v456_v24  ;;  %v427_v24 = vld [vmem:[#allocation2 + $0xe0] sm:$0xff] }
  0x99   : > { %v520_v30 = vadd.f32 %v488_v27, %v424_v21  ;;  %v1653_v21 = vunpack.c.l.bf16 %v1672_v18 }
  0x9b   : > { %vm552_vm15 = vcmp.ge.f32.partialorder %v520_v30, 1.0  ;;  %v459_v27 = vsub.f32 %v1653_v21, %v427_v24 }
  0x9c   : > { %v1507_v36 = vsel %vm552_vm15, 1.0, %v1762_v37  ;;  %v584_v47 = vsel %vm552_vm15, 0.0, %v520_v30 }
  0x9d   : > { %617 = vst.msk [vmem:[#allocation2 + $0xc8] sm:$0xff] %vm591_vm2, %v584_v47  ;;  %v491_v30 = vmul.f32 0.5, %v459_v27 }
  0xa3   : > { %1522 = vmatmul.msk.bf16.gmra.mxu0 %vm591_vm2, %v692_v45  ;;  %v695_v45 = vpack.c.bf16 %v1497_v39, %v1496_v38 }
  0xb3   : > { %1523 = vmatmul.msk.bf16.gmra.mxu0 %vm591_vm2, %v693_v61  ;;  %v485_v61 = vmul.f32 0.5, %v453_v57  ;;  %v457_v57 = vsub.f32 %v1649_v51, %v425_v54 }
  0xb5   : > { %v517_v0 = vadd.f32 %v485_v61, %v421_v55  ;;  %v426_v55 = vld [vmem:[#allocation2 + $0xd8] sm:$0xff]  ;;  %v489_v60 = vmul.f32 0.5, %v457_v57 }
  0xb6   : > { %v458_v58 = vsub.f32 %v1650_v52, %v426_v55  ;;  %v1673_v52 = vld [vmem:[%s1826_s7 + $0x78] sm:$0xff]  }
  0xb7   : > { %vm549_vm10 = vcmp.ge.f32.partialorder %v517_v0, 1.0 }
  0xb8   : > { %v1504_v6 = vsel %vm549_vm10, 1.0, %v1762_v37  ;;  %v581_v12 = vsel %vm549_vm10, 0.0, %v517_v0  ;;  %v490_v61 = vmul.f32 0.5, %v458_v58  ;;  %v521_v0 = vadd.f32 %v489_v60, %v425_v54  ;;  %v860_v54 = vld [vmem:[#allocation3 + $0x38] sm:$0xff]  ;;  %v429_v58 = vld [vmem:[#allocation2 + $0xf0] sm:$0xff] }
  0xb9   : > { %v699_v8 = vpack.c.bf16 %v1505_v7, %v1504_v6  ;;  %614 = vst.msk [vmem:[#allocation2 + $0xb0] sm:$0xff] %vm591_vm2, %v581_v12 }
  0xba   : > { %v522_v1 = vadd.f32 %v490_v61, %v426_v55  ;;  %vm553_vm3 = vcmp.ge.f32.partialorder %v521_v0, 1.0  ;;  %v1657_v55 = vunpack.c.l.bf16 %v1673_v52 }
  0xbb   : > { %1529 = vmatmul.msk.bf16.gmra.mxu3 %vm591_vm2, %v699_v8  ;;  %v1508_v6 = vsel %vm553_vm3, 1.0, %v1762_v37 }
  0xbc   : > { %vm554_vm4 = vcmp.ge.f32.partialorder %v522_v1, 1.0  ;;  %v461_v61 = vsub.f32 %v1657_v55, %v429_v58 }
  0xbd   : > { %v1509_v7 = vsel %vm554_vm4, 1.0, %v1762_v37 }
  0xc3   : > { %1524 = vmatmul.msk.bf16.gmra.mxu0 %vm591_vm2, %v694_v20  ;;  %v423_v20 = vld [vmem:[#allocation2 + $0xc0] sm:$0xff] }
  0xc4   : > { %v455_v23 = vsub.f32 %v1645_v17, %v423_v20  ;;  %v586_v17 = vsel %vm554_vm4, 0.0, %v522_v1  ;;  %v493_v1 = vmul.f32 0.5, %v461_v61 }
  0xc5   : > { %619 = vst.msk [vmem:[#allocation2 + $0xd8] sm:$0xff] %vm591_vm2, %v586_v17 }
  0xc6   : > { %v487_v26 = vmul.f32 0.5, %v455_v23 }
  0xc8   : > { %v519_v29 = vadd.f32 %v487_v26, %v423_v20  ;;  %v858_v20 = vld [vmem:[#allocation3 + $0x28] sm:$0xff] }
  0xca   : > { %vm551_vm14 = vcmp.ge.f32.partialorder %v519_v29, 1.0 }
  0xcb   : > { %v1506_v35 = vsel %vm551_vm14, 1.0, %v1762_v37  ;;  %v583_v46 = vsel %vm551_vm14, 0.0, %v519_v29 }
  0xcc   : > { %v700_v41 = vpack.c.bf16 %v1507_v36, %v1506_v35  ;;  %616 = vst.msk [vmem:[#allocation2 + $0xc0] sm:$0xff] %vm591_vm2, %v583_v46 }
  0xce   : > { %1530 = vmatmul.msk.bf16.gmra.mxu3 %vm591_vm2, %v700_v41 }
  0xd3   : > { %1525 = vmatmul.msk.bf16.gmra.mxu0 %vm591_vm2, %v695_v45 }
  0xe0   : > { %v773_v3 = vpop.f32.mrf.mxu0 }
  0xe1   : > { %v774_v5 = vadd.f32 %v2071_v63, %v773_v3 }
  0xe3   : > { %v885_v9 = vsub.f32 %v774_v5, %v853_v4  ;;  %1526 = vmatmul.msk.bf16.gmra.mxu0 %vm591_vm2, %v696_v2 }
  0xe5   : > { %v917_v10 = vmul.f32 0.5, %v885_v9 }
  0xe7   : > { %v949_v11 = vadd.f32 %v917_v10, %v853_v4  ;;  %v857_v4 = vld [vmem:[#allocation3 + $0x20] sm:$0xff] }
  0xe8   : > { %v775_v15 = vpop.f32.mrf.mxu0 }
  0xe9   : > { %v776_v19 = vadd.f32 %v2071_v63, %v775_v15  ;;  %vm981_vm13 = vcmp.ge.f32.partialorder %v949_v11, 1.0 }
  0xea   : > { %v1013_v22 = vsel %vm981_vm13, 0.0, %v949_v11  ;;  %v1534_v39 = vsel %vm981_vm13, 1.0, %v1762_v37  ;;  %v701_v11 = vpack.c.bf16 %v1509_v7, %v1508_v6 }
  0xeb   : > { %v886_v25 = vsub.f32 %v776_v19, %v854_v16  ;;  %1046 = vst.msk [vmem:[#allocation3] sm:$0xff] %vm1045_vm12, %v1013_v22  ;;  %v1654_v22 = vunpack.c.h.bf16 %v1672_v18 }
  0xec   : > { %1531 = vmatmul.msk.bf16.gmra.mxu3 %vm591_vm2, %v701_v11 }
  0xed   : > { %v918_v28 = vmul.f32 0.5, %v886_v25  ;;  %v428_v25 = vld [vmem:[#allocation2 + $0xe8] sm:$0xff] }
  0xef   : > { %v950_v31 = vadd.f32 %v918_v28, %v854_v16  ;;  %v585_v16 = vsel %vm553_vm3, 0.0, %v521_v0  ;;  %v460_v28 = vsub.f32 %v1654_v22, %v428_v25 }
  0xf0   : > { %v778_v32 = vpop.f32.mrf.mxu0  ;;  %618 = vst.msk [vmem:[#allocation2 + $0xd0] sm:$0xff] %vm591_vm2, %v585_v16 }
  0xf1   : > { %v779_v34 = vadd.f32 %v2071_v63, %v778_v32  ;;  %vm982_vm0 = vcmp.ge.f32.partialorder %v950_v31, 1.0 }
  0xf2   : > { %v1014_v38 = vsel %vm982_vm0, 0.0, %v950_v31  ;;  %v1535_v40 = vsel %vm982_vm0, 1.0, %v1762_v37  ;;  %v492_v31 = vmul.f32 0.5, %v460_v28 }
  0xf3   : > { %v887_v42 = vsub.f32 %v779_v34, %v855_v33  ;;  %1047 = vst.msk [vmem:[#allocation3 + $0x8] sm:$0xff] %vm1045_vm12, %v1014_v38  ;;  %v1142_v43 = vpack.c.bf16 %v1535_v40, %v1534_v39  ;;  %v859_v38 = vld [vmem:[#allocation3 + $0x30] sm:$0xff] }
  0xf4   : > { %v524_v34 = vadd.f32 %v492_v31, %v428_v25 }
  0xf5   : > { %v919_v44 = vmul.f32 0.5, %v887_v42  ;;  %1574 = vmatmul.msk.bf16.vlgmr.msra.gmra.mxu1 %vm1045_vm12, %v1142_v43 }
  0xf6   : > { %vm556_vm8 = vcmp.ge.f32.partialorder %v524_v34, 1.0 }
  0xf7   : > { %v951_v45 = vadd.f32 %v919_v44, %v855_v33  ;;  %v523_v33 = vadd.f32 %v491_v30, %v427_v24  ;;  %v1511_v41 = vsel %vm556_vm8, 1.0, %v1762_v37  ;;  %v588_v51 = vsel %vm556_vm8, 0.0, %v524_v34  ;;  %v863_v30 = vld [vmem:[#allocation3 + $0x50] sm:$0xff] }
  0xf8   : > { %v780_v49 = vpop.f32.mrf.mxu0  ;;  %621 = vst.msk [vmem:[#allocation2 + $0xe8] sm:$0xff] %vm591_vm2, %v588_v51 }
  0xf9   : > { %v781_v53 = vadd.f32 %v2071_v63, %v780_v49  ;;  %vm983_vm1 = vcmp.ge.f32.partialorder %v951_v45, 1.0  ;;  %vm555_vm7 = vcmp.ge.f32.partialorder %v523_v33, 1.0 }
  0xfa   : > { %v1015_v56 = vsel %vm983_vm1, 0.0, %v951_v45  ;;  %v1536_v9 = vsel %vm983_vm1, 1.0, %v1762_v37  ;;  %v1510_v40 = vsel %vm555_vm7, 1.0, %v1762_v37 }
  0xfb   : > { %v888_v59 = vsub.f32 %v781_v53, %v856_v50  ;;  %1048 = vst.msk [vmem:[#allocation3 + $0x10] sm:$0xff] %vm1045_vm12, %v1015_v56  ;;  %v702_v45 = vpack.c.bf16 %v1511_v41, %v1510_v40  ;;  %v1658_v56 = vunpack.c.h.bf16 %v1673_v52  ;;  %v864_v41 = vld [vmem:[#allocation3 + $0x58] sm:$0xff] }
  0xfd   : > { %v920_v62 = vmul.f32 0.5, %v888_v59  ;;  %1532 = vmatmul.msk.bf16.gmra.mxu3 %vm591_vm2, %v702_v45  ;;  %v430_v59 = vld [vmem:[#allocation2 + $0xf8] sm:$0xff] }
  0xff   : > { %v952_v2 = vadd.f32 %v920_v62, %v856_v50  ;;  %v587_v50 = vsel %vm555_vm7, 0.0, %v523_v33  ;;  %v462_v62 = vsub.f32 %v1658_v56, %v430_v59 }
 0x100   : > { %v783_v3 = vpop.f32.mrf.mxu0  ;;  %620 = vst.msk [vmem:[#allocation2 + $0xe0] sm:$0xff] %vm591_vm2, %v587_v50 }
 0x101   : > { %v784_v5 = vadd.f32 %v2071_v63, %v783_v3  ;;  %vm984_vm5 = vcmp.ge.f32.partialorder %v952_v2, 1.0 }
 0x102   : > { %v1016_v8 = vsel %vm984_vm5, 0.0, %v952_v2  ;;  %v1537_v10 = vsel %vm984_vm5, 1.0, %v1762_v37  ;;  %v494_v2 = vmul.f32 0.5, %v462_v62  ;;  %v871_v62 = vld [vmem:[#allocation3 + $0x90] sm:$0xff] }
 0x103   : > { %v889_v12 = vsub.f32 %v784_v5, %v857_v4  ;;  %1049 = vst.msk [vmem:[#allocation3 + $0x18] sm:$0xff] %vm1045_vm12, %v1016_v8  ;;  %v1143_v13 = vpack.c.bf16 %v1537_v10, %v1536_v9  ;;  %v861_v8 = vld [vmem:[#allocation3 + $0x40] sm:$0xff] }
 0x104   : > { %v526_v5 = vadd.f32 %v494_v2, %v430_v59  ;;  %v866_v59 = vld [vmem:[#allocation3 + $0x68] sm:$0xff] }
 0x105   : > { %v921_v14 = vmul.f32 0.5, %v889_v12  ;;  %1575 = vmatmul.msk.bf16.gmra.mxu1 %vm1045_vm12, %v1143_v13 }
 0x106   : > { %vm558_vm13 = vcmp.ge.f32.partialorder %v526_v5, 1.0 }
 0x107   : > { %v953_v15 = vadd.f32 %v921_v14, %v857_v4  ;;  %v525_v4 = vadd.f32 %v493_v1, %v429_v58  ;;  %v1513_v11 = vsel %vm558_vm13, 1.0, %v1762_v37  ;;  %v590_v21 = vsel %vm558_vm13, 0.0, %v526_v5 }
 0x108   : > { %v785_v19 = vpop.f32.mrf.mxu0  ;;  %623 = vst.msk [vmem:[#allocation2 + $0xf8] sm:$0xff] %vm591_vm2, %v590_v21 }
 0x109   : > { %v786_v23 = vadd.f32 %v2071_v63, %v785_v19  ;;  %vm985_vm6 = vcmp.ge.f32.partialorder %v953_v15, 1.0  ;;  %vm557_vm11 = vcmp.ge.f32.partialorder %v525_v4, 1.0 }
 0x10a   : > { %v1017_v26 = vsel %vm985_vm6, 0.0, %v953_v15  ;;  %v1538_v43 = vsel %vm985_vm6, 1.0, %v1762_v37  ;;  %v1512_v10 = vsel %vm557_vm11, 1.0, %v1762_v37 }
 0x10b   : > { %v890_v29 = vsub.f32 %v786_v23, %v858_v20  ;;  %1050 = vst.msk [vmem:[#allocation3 + $0x20] sm:$0xff] %vm1045_vm12, %v1017_v26  ;;  %v703_v15 = vpack.c.bf16 %v1513_v11, %v1512_v10  ;;  %v862_v23 = vld [vmem:[#allocation3 + $0x48] sm:$0xff] }
 0x10d   : > { %v922_v32 = vmul.f32 0.5, %v890_v29  ;;  %1533 = vmatmul.msk.bf16.gmra.mxu3 %vm591_vm2, %v703_v15 }
 0x10f   : > { %v954_v35 = vadd.f32 %v922_v32, %v858_v20  ;;  %v589_v20 = vsel %vm557_vm11, 0.0, %v525_v4 }
 0x110   : > { %v788_v36 = vpop.f32.mrf.mxu0  ;;  %622 = vst.msk [vmem:[#allocation2 + $0xf0] sm:$0xff] %vm591_vm2, %v589_v20 }
 0x111   : > { %v789_v39 = vadd.f32 %v2071_v63, %v788_v36  ;;  %vm986_vm9 = vcmp.ge.f32.partialorder %v954_v35, 1.0 }
 0x112   : > { %v1018_v42 = vsel %vm986_vm9, 0.0, %v954_v35  ;;  %v1539_v44 = vsel %vm986_vm9, 1.0, %v1762_v37 }
 0x113   : > { %v891_v46 = vsub.f32 %v789_v39, %v859_v38  ;;  %1051 = vst.msk [vmem:[#allocation3 + $0x28] sm:$0xff] %vm1045_vm12, %v1018_v42  ;;  %v1144_v47 = vpack.c.bf16 %v1539_v44, %v1538_v43 }
 0x115   : > { %v923_v48 = vmul.f32 0.5, %v891_v46  ;;  %1576 = vmatmul.msk.bf16.gmra.mxu1 %vm1045_vm12, %v1144_v47 }
 0x117   : > { %v955_v49 = vadd.f32 %v923_v48, %v859_v38  ;;  %v865_v48 = vld [vmem:[#allocation3 + $0x60] sm:$0xff] }
 0x118   : > { %v790_v53 = vpop.f32.mrf.mxu0 }
 0x119   : > { %v791_v57 = vadd.f32 %v2071_v63, %v790_v53  ;;  %vm987_vm10 = vcmp.ge.f32.partialorder %v955_v49, 1.0 }
 0x11a   : > { %v1019_v60 = vsel %vm987_vm10, 0.0, %v955_v49  ;;  %v1540_v13 = vsel %vm987_vm10, 1.0, %v1762_v37 }
 0x11b   : > { %v892_v0 = vsub.f32 %v791_v57, %v860_v54  ;;  %1052 = vst.msk [vmem:[#allocation3 + $0x30] sm:$0xff] %vm1045_vm12, %v1019_v60  ;;  %v818_v57 = vpop.f32.mrf.mxu3 }
 0x11c   : > { %v819_v60 = vadd.f32 %v2071_v63, %v818_v57  ;;  %v870_v57 = vld [vmem:[#allocation3 + $0x88] sm:$0xff] }
 0x11d   : > { %v924_v3 = vmul.f32 0.5, %v892_v0 }
 0x11e   : > { %v903_v2 = vsub.f32 %v819_v60, %v871_v62  ;;  %v875_v60 = vld [vmem:[#allocation3 + $0xb0] sm:$0xff] }
 0x11f   : > { %v956_v6 = vadd.f32 %v924_v3, %v860_v54 }
 0x120   : > { %v793_v7 = vpop.f32.mrf.mxu0 }
 0x121   : > { %v794_v9 = vadd.f32 %v2071_v63, %v793_v7  ;;  %vm988_vm14 = vcmp.ge.f32.partialorder %v956_v6, 1.0 }
 0x122   : > { %v1020_v12 = vsel %vm988_vm14, 0.0, %v956_v6  ;;  %v1541_v14 = vsel %vm988_vm14, 1.0, %v1762_v37  ;;  %v872_v6 = vld [vmem:[#allocation3 + $0x98] sm:$0xff]  ;;  %vm1347_vm14 = vcmask 125952  }
 0x123   : > { %v893_v16 = vsub.f32 %v794_v9, %v861_v8  ;;  %1053 = vst.msk [vmem:[#allocation3 + $0x38] sm:$0xff] %vm1045_vm12, %v1020_v12  ;;  %v1145_v17 = vpack.c.bf16 %v1541_v14, %v1540_v13  ;;  %v820_v5 = vpop.f32.mrf.mxu3  ;;  %v935_v9 = vmul.f32 0.5, %v903_v2 }
 0x124   : > { %v821_v10 = vadd.f32 %v2071_v63, %v820_v5  ;;  %v2227_v5 = vld [vmem:[%s2453_s4] ss:$0 sm:$0xff] }
 0x125   : > { %v925_v18 = vmul.f32 0.5, %v893_v16  ;;  %1577 = vmatmul.msk.bf16.gmra.mxu1 %vm1045_vm12, %v1145_v17 }
 0x126   : > { %v904_v15 = vsub.f32 %v821_v10, %v872_v6 }
 0x127   : > { %v957_v19 = vadd.f32 %v925_v18, %v861_v8  ;;  %v867_v8 = vld [vmem:[#allocation3 + $0x70] sm:$0xff]  ;;  %v2180_v18 = vadd.f32 %v935_v9, %v871_v62 }
 0x128   : > { %v795_v22 = vpop.f32.mrf.mxu0 }
 0x129   : > { %v796_v24 = vadd.f32 %v2071_v63, %v795_v22  ;;  %vm989_vm15 = vcmp.ge.f32.partialorder %v957_v19, 1.0  ;;  %vm999_vm5 = vcmp.ge.f32.partialorder %v2180_v18, 1.0 }
 0x12a   : > { %v1021_v25 = vsel %vm989_vm15, 0.0, %v957_v19  ;;  %v1542_v33 = vsel %vm989_vm15, 1.0, %v1762_v37  ;;  %v936_v19 = vmul.f32 0.5, %v904_v15 }
 0x12b   : > { %v894_v26 = vsub.f32 %v796_v24, %v862_v23  ;;  %1054 = vst.msk [vmem:[#allocation3 + $0x40] sm:$0xff] %vm1045_vm12, %v1021_v25  ;;  %v868_v25 = vld [vmem:[#allocation3 + $0x78] sm:$0xff] }
 0x12c   : > { %v2183_v21 = vadd.f32 %v936_v19, %v872_v6 }
 0x12d   : > { %v926_v27 = vmul.f32 0.5, %v894_v26 }
 0x12e   : > { %vm1000_vm6 = vcmp.ge.f32.partialorder %v2183_v21, 1.0 }
 0x12f   : > { %v958_v28 = vadd.f32 %v926_v27, %v862_v23  ;;  %v823_v23 = vpop.f32.mrf.mxu3 }
 0x130   : > { %v798_v29 = vpop.f32.mrf.mxu0  ;;  %v824_v26 = vadd.f32 %v2071_v63, %v823_v23 }
 0x131   : > { %v799_v31 = vadd.f32 %v2071_v63, %v798_v29  ;;  %vm990_vm0 = vcmp.ge.f32.partialorder %v958_v28, 1.0  ;;  %v1031_v29 = vsel %vm999_vm5, 0.0, %v2180_v18 }
 0x132   : > { %v1022_v32 = vsel %vm990_vm0, 0.0, %v958_v28  ;;  %v1543_v34 = vsel %vm990_vm0, 1.0, %v1762_v37  ;;  %v873_v28 = vld [vmem:[#allocation3 + $0xa0] sm:$0xff]  ;;  %1064 = vst.msk [vmem:[#allocation3 + $0x90] sm:$0xff] %vm1045_vm12, %v1031_v29 }
 0x133   : > { %v895_v35 = vsub.f32 %v799_v31, %v863_v30  ;;  %1055 = vst.msk [vmem:[#allocation3 + $0x48] sm:$0xff] %vm1045_vm12, %v1022_v32  ;;  %v1146_v36 = vpack.c.bf16 %v1543_v34, %v1542_v33  ;;  %v905_v33 = vsub.f32 %v824_v26, %v873_v28 }
 0x135   : > { %v927_v38 = vmul.f32 0.5, %v895_v35  ;;  %1578 = vmatmul.msk.bf16.gmra.mxu1 %vm1045_vm12, %v1146_v36 }
 0x137   : > { %v959_v39 = vadd.f32 %v927_v38, %v863_v30  ;;  %v1032_v30 = vsel %vm1000_vm6, 0.0, %v2183_v21  ;;  %v825_v36 = vpop.f32.mrf.mxu3  ;;  %v874_v38 = vld [vmem:[#allocation3 + $0xa8] sm:$0xff] }
 0x138   : > { %v800_v40 = vpop.f32.mrf.mxu0  ;;  %1065 = vst.msk [vmem:[#allocation3 + $0x98] sm:$0xff] %vm1045_vm12, %v1032_v30 }
 0x139   : > { %v801_v42 = vadd.f32 %v2071_v63, %v800_v40  ;;  %vm991_vm2 = vcmp.ge.f32.partialorder %v959_v39, 1.0  ;;  %v869_v40 = vld [vmem:[#allocation3 + $0x80] sm:$0xff] }
 0x13a   : > { %v1023_v43 = vsel %vm991_vm2, 0.0, %v959_v39  ;;  %v1544_v51 = vsel %vm991_vm2, 1.0, %v1762_v37 }
 0x13b   : > { %v896_v44 = vsub.f32 %v801_v42, %v864_v41  ;;  %1056 = vst.msk [vmem:[#allocation3 + $0x50] sm:$0xff] %vm1045_vm12, %v1023_v43  ;;  %v826_v42 = vadd.f32 %v2071_v63, %v825_v36 }
 0x13d   : > { %v928_v45 = vmul.f32 0.5, %v896_v44 }
 0x13f   : > { %v960_v46 = vadd.f32 %v928_v45, %v864_v41  ;;  %v937_v41 = vmul.f32 0.5, %v905_v33  ;;  %v878_v33 = vld [vmem:[#allocation3 + $0xc8] sm:$0xff] }
 0x140   : > { %v803_v47 = vpop.f32.mrf.mxu0 }
 0x141   : > { %v804_v49 = vadd.f32 %v2071_v63, %v803_v47  ;;  %vm992_vm1 = vcmp.ge.f32.partialorder %v960_v46, 1.0  ;;  %v906_v47 = vsub.f32 %v826_v42, %v874_v38 }
 0x142   : > { %v1024_v50 = vsel %vm992_vm1, 0.0, %v960_v46  ;;  %v1545_v52 = vsel %vm992_vm1, 1.0, %v1762_v37 }
 0x143   : > { %v897_v53 = vsub.f32 %v804_v49, %v865_v48  ;;  %1057 = vst.msk [vmem:[#allocation3 + $0x58] sm:$0xff] %vm1045_vm12, %v1024_v50  ;;  %v1147_v54 = vpack.c.bf16 %v1545_v52, %v1544_v51  ;;  %v2205_v50 = vadd.f32 %v937_v41, %v873_v28  ;;  %v938_v51 = vmul.f32 0.5, %v906_v47  ;;  %v879_v47 = vld [vmem:[#allocation3 + $0xd0] sm:$0xff] }
 0x145   : > { %v929_v55 = vmul.f32 0.5, %v897_v53  ;;  %1579 = vmatmul.msk.bf16.gmra.mxu1 %vm1045_vm12, %v1147_v54  ;;  %v2208_v53 = vadd.f32 %v938_v51, %v874_v38  ;;  %vm1001_vm9 = vcmp.ge.f32.partialorder %v2205_v50, 1.0 }
 0x147   : > { %v961_v56 = vadd.f32 %v929_v55, %v865_v48  ;;  %v828_v55 = vpop.f32.mrf.mxu3  ;;  %vm1002_vm10 = vcmp.ge.f32.partialorder %v2208_v53, 1.0 }
 0x148   : > { %v805_v58 = vpop.f32.mrf.mxu0  ;;  %v1034_v62 = vsel %vm1002_vm10, 0.0, %v2208_v53 }
 0x149   : > { %v806_v61 = vadd.f32 %v2071_v63, %v805_v58  ;;  %vm993_vm3 = vcmp.ge.f32.partialorder %v961_v56, 1.0  ;;  %v829_v58 = vadd.f32 %v2071_v63, %v828_v55  ;;  %1067 = vst.msk [vmem:[#allocation3 + $0xa8] sm:$0xff] %vm1045_vm12, %v1034_v62 }
 0x14a   : > { %v1025_v0 = vsel %vm993_vm3, 0.0, %v961_v56  ;;  %v1546_v13 = vsel %vm993_vm3, 1.0, %v1762_v37 }
 0x14b   : > { %v898_v1 = vsub.f32 %v806_v61, %v866_v59  ;;  %1058 = vst.msk [vmem:[#allocation3 + $0x60] sm:$0xff] %vm1045_vm12, %v1025_v0  ;;  %v1033_v61 = vsel %vm1001_vm9, 0.0, %v2205_v50  ;;  %v907_v2 = vsub.f32 %v829_v58, %v875_v60  ;;  %v1554_v58 = vsel %vm1001_vm9, 1.0, %v1762_v37 }
 0x14c   : > { %1066 = vst.msk [vmem:[#allocation3 + $0xa0] sm:$0xff] %vm1045_vm12, %v1033_v61 }
 0x14d   : > { %v930_v3 = vmul.f32 0.5, %v898_v1 }
 0x14f   : > { %v962_v4 = vadd.f32 %v930_v3, %v866_v59  ;;  %v830_v6 = vpop.f32.mrf.mxu3 }
 0x150   : > { %v808_v7 = vpop.f32.mrf.mxu0  ;;  %v831_v9 = vadd.f32 %v2071_v63, %v830_v6 }
 0x151   : > { %v809_v11 = vadd.f32 %v2071_v63, %v808_v7  ;;  %vm994_vm4 = vcmp.ge.f32.partialorder %v962_v4, 1.0  ;;  %v876_v7 = vld [vmem:[#allocation3 + $0xb8] sm:$0xff] }
 0x152   : > { %v1026_v12 = vsel %vm994_vm4, 0.0, %v962_v4  ;;  %v1547_v14 = vsel %vm994_vm4, 1.0, %v1762_v37 }
 0x153   : > { %v899_v16 = vsub.f32 %v809_v11, %v867_v8  ;;  %1059 = vst.msk [vmem:[#allocation3 + $0x68] sm:$0xff] %vm1045_vm12, %v1026_v12  ;;  %v1148_v17 = vpack.c.bf16 %v1547_v14, %v1546_v13  ;;  %v908_v14 = vsub.f32 %v831_v9, %v876_v7 }
 0x155   : > { %v931_v20 = vmul.f32 0.5, %v899_v16  ;;  %1580 = vmatmul.msk.bf16.gmra.mxu1 %vm1045_vm12, %v1148_v17  ;;  %v940_v19 = vmul.f32 0.5, %v908_v14 }
 0x157   : > { %v963_v22 = vadd.f32 %v931_v20, %v867_v8  ;;  %v939_v8 = vmul.f32 0.5, %v907_v2  ;;  %v833_v23 = vpop.f32.mrf.mxu3 }
 0x158   : > { %v810_v24 = vpop.f32.mrf.mxu0 }
 0x159   : > { %v811_v27 = vadd.f32 %v2071_v63, %v810_v24  ;;  %vm995_vm7 = vcmp.ge.f32.partialorder %v963_v22, 1.0  ;;  %v2235_v17 = vadd.f32 %v939_v8, %v875_v60  ;;  %v834_v24 = vadd.f32 %v2071_v63, %v833_v23  ;;  %v881_v8 = vld [vmem:[#allocation3 + $0xe0] sm:$0xff] }
 0x15a   : > { %v1027_v31 = vsel %vm995_vm7, 0.0, %v963_v22  ;;  %v1548_v45 = vsel %vm995_vm7, 1.0, %v1762_v37  ;;  %v2238_v22 = vadd.f32 %v940_v19, %v876_v7 }
 0x15b   : > { %v900_v32 = vsub.f32 %v811_v27, %v868_v25  ;;  %1060 = vst.msk [vmem:[#allocation3 + $0x70] sm:$0xff] %vm1045_vm12, %v1027_v31  ;;  %vm1003_vm15 = vcmp.ge.f32.partialorder %v2235_v17, 1.0 }
 0x15c   : > { %vm1004_vm0 = vcmp.ge.f32.partialorder %v2238_v22, 1.0  ;;  %v1035_v26 = vsel %vm1003_vm15, 0.0, %v2235_v17  ;;  %v1556_v19 = vsel %vm1003_vm15, 1.0, %v1762_v37 }
 0x15d   : > { %v932_v34 = vmul.f32 0.5, %v900_v32  ;;  %v1036_v27 = vsel %vm1004_vm0, 0.0, %v2238_v22  ;;  %1068 = vst.msk [vmem:[#allocation3 + $0xb0] sm:$0xff] %vm1045_vm12, %v1035_v26 }
 0x15e   : > { %1069 = vst.msk [vmem:[#allocation3 + $0xb8] sm:$0xff] %vm1045_vm12, %v1036_v27 }
 0x15f   : > { %v964_v35 = vadd.f32 %v932_v34, %v868_v25  ;;  %v877_v25 = vld [vmem:[#allocation3 + $0xc0] sm:$0xff]  ;;  %v835_v32 = vpop.f32.mrf.mxu3  ;;  %v1552_v34 = vsel %vm999_vm5, 1.0, %v1762_v37 }
 0x160   : > { %v813_v39 = vpop.f32.mrf.mxu0  ;;  %v909_v30 = vsub.f32 %v834_v24, %v877_v25  ;;  %v836_v38 = vadd.f32 %v2071_v63, %v835_v32 }
 0x161   : > { %v814_v43 = vadd.f32 %v2071_v63, %v813_v39  ;;  %vm996_vm8 = vcmp.ge.f32.partialorder %v964_v35, 1.0 }
 0x162   : > { %v1028_v44 = vsel %vm996_vm8, 0.0, %v964_v35  ;;  %v1549_v46 = vsel %vm996_vm8, 1.0, %v1762_v37  ;;  %v1553_v35 = vsel %vm1000_vm6, 1.0, %v1762_v37  ;;  %v941_v36 = vmul.f32 0.5, %v909_v30 }
 0x163   : > { %v901_v48 = vsub.f32 %v814_v43, %v869_v40  ;;  %1061 = vst.msk [vmem:[#allocation3 + $0x78] sm:$0xff] %vm1045_vm12, %v1028_v44  ;;  %v1149_v49 = vpack.c.bf16 %v1549_v46, %v1548_v45  ;;  %v1151_v42 = vpack.c.bf16 %v1553_v35, %v1552_v34 }
 0x164   : > { %v2264_v43 = vadd.f32 %v941_v36, %v877_v25 }
 0x165   : > { %v933_v52 = vmul.f32 0.5, %v901_v48  ;;  %1581 = vmatmul.msk.bf16.gmra.mxu1 %vm1045_vm12, %v1149_v49 }
 0x166   : > { %vm1005_vm2 = vcmp.ge.f32.partialorder %v2264_v43, 1.0 }
 0x167   : > { %v965_v54 = vadd.f32 %v933_v52, %v869_v40  ;;  %v910_v40 = vsub.f32 %v836_v38, %v878_v33  ;;  %v1037_v48 = vsel %vm1005_vm2, 0.0, %v2264_v43 }
 0x168   : > { %v815_v56 = vpop.f32.mrf.mxu0  ;;  %1070 = vst.msk [vmem:[#allocation3 + $0xc0] sm:$0xff] %vm1045_vm12, %v1037_v48 }
 0x169   : > { %v816_v59 = vadd.f32 %v2071_v63, %v815_v56  ;;  %vm997_vm11 = vcmp.ge.f32.partialorder %v965_v54, 1.0  ;;  %v942_v44 = vmul.f32 0.5, %v910_v40 }
 0x16a   : > { %v1029_v0 = vsel %vm997_vm11, 0.0, %v965_v54  ;;  %v1550_v12 = vsel %vm997_vm11, 1.0, %v1762_v37 }
 0x16b   : > { %v902_v1 = vsub.f32 %v816_v59, %v870_v57  ;;  %1062 = vst.msk [vmem:[#allocation3 + $0x80] sm:$0xff] %vm1045_vm12, %v1029_v0  ;;  %v2267_v18 = vadd.f32 %v942_v44, %v878_v33  ;;  %v1555_v59 = vsel %vm1002_vm10, 1.0, %v1762_v37  ;;  %v883_v33 = vld [vmem:[#allocation3 + $0xf0] sm:$0xff]  ;;  %v1558_v44 = vsel %vm1005_vm2, 1.0, %v1762_v37 }
 0x16c   : > { %v1152_v2 = vpack.c.bf16 %v1555_v59, %v1554_v58 }
 0x16d   : > { %v934_v3 = vmul.f32 0.5, %v902_v1  ;;  %vm1006_vm1 = vcmp.ge.f32.partialorder %v2267_v18, 1.0 }
 0x16e   : > { %v1038_v49 = vsel %vm1006_vm1, 0.0, %v2267_v18 }
 0x16f   : > { %v966_v4 = vadd.f32 %v934_v3, %v870_v57  ;;  %v838_v21 = vpop.f32.mrf.mxu3  ;;  %1071 = vst.msk [vmem:[#allocation3 + $0xc8] sm:$0xff] %vm1045_vm12, %v1038_v49  ;;  %v880_v57 = vld [vmem:[#allocation3 + $0xd8] sm:$0xff] }
 0x170   : > { %v839_v46 = vadd.f32 %v2071_v63, %v838_v21 }
 0x171   : > { %vm998_vm13 = vcmp.ge.f32.partialorder %v966_v4, 1.0 }
 0x172   : > { %v1235_v10 = vpop.f32.mrf.mxu1  ;;  %v1030_v11 = vsel %vm998_vm13, 0.0, %v966_v4  ;;  %v1551_v13 = vsel %vm998_vm13, 1.0, %v1762_v37  ;;  %v911_v54 = vsub.f32 %v839_v46, %v879_v47 }
 0x173   : > { %v1236_v15 = vadd.f32 %v2227_v5, %v1235_v10  ;;  %1063 = vst.msk [vmem:[#allocation3 + $0x88] sm:$0xff] %vm1045_vm12, %v1030_v11  ;;  %v1150_v16 = vpack.c.bf16 %v1551_v13, %v1550_v12 }
 0x174   : > { %v943_v60 = vmul.f32 0.5, %v911_v54 }
 0x175   : > { %v1315_v20 = vpack.c.bf16 %v1236_v15, %v1236_v15  ;;  %1582 = vmatmul.msk.bf16.vlgmr.msra.gmra.mxu2 %vm1045_vm12, %v1150_v16  ;;  %v882_v16 = vld [vmem:[#allocation3 + $0xe8] sm:$0xff] }
 0x176   : > { %v2293_v3 = vadd.f32 %v943_v60, %v879_v47 }
 0x177   : > { %1348 = vst.msk [vmem:[%s1831_s10] sm:$0xf] %vm1347_vm14, %v1315_v20  ;;  %v840_v56 = vpop.f32.mrf.mxu3  ;;  %v1557_v20 = vsel %vm1004_vm0, 1.0, %v1762_v37 }
 0x178   : > { %v841_v61 = vadd.f32 %v2071_v63, %v840_v56  ;;  %vm1007_vm3 = vcmp.ge.f32.partialorder %v2293_v3, 1.0 }
 0x179   : > { %v1039_v9 = vsel %vm1007_vm3, 0.0, %v2293_v3  ;;  %v1560_v59 = vsel %vm1007_vm3, 1.0, %v1762_v37 }
 0x17a   : > { %v1237_v28 = vpop.f32.mrf.mxu1  ;;  %v912_v0 = vsub.f32 %v841_v61, %v880_v57  ;;  %1072 = vst.msk [vmem:[#allocation3 + $0xd0] sm:$0xff] %vm1045_vm12, %v1039_v9 }
 0x17b   : > { %v1238_v29 = vadd.f32 %v2227_v5, %v1237_v28  ;;  %v1153_v28 = vpack.c.bf16 %v1557_v20, %v1556_v19 }
 0x17c   : > { %v944_v4 = vmul.f32 0.5, %v912_v0 }
 0x17d   : > { %v1316_v31 = vpack.c.bf16 %v1238_v29, %v1238_v29 }
 0x17e   : > { %v2296_v50 = vadd.f32 %v944_v4, %v880_v57 }
 0x17f   : > { %1349 = vst.msk [vmem:[%s1831_s10 + $0x4] sm:$0xf] %vm1347_vm14, %v1316_v31 }
 0x180   : > { %v843_v53 = vpop.f32.mrf.mxu3  ;;  %vm1008_vm4 = vcmp.ge.f32.partialorder %v2296_v50, 1.0 }
 0x181   : > { %v844_v7 = vadd.f32 %v2071_v63, %v843_v53  ;;  %v1040_v10 = vsel %vm1008_vm4, 0.0, %v2296_v50  ;;  %v1561_v60 = vsel %vm1008_vm4, 1.0, %v1762_v37 }
 0x182   : > { %v1240_v39 = vpop.f32.mrf.mxu1  ;;  %1073 = vst.msk [vmem:[#allocation3 + $0xd8] sm:$0xff] %vm1045_vm12, %v1040_v10  ;;  %v1155_v0 = vpack.c.bf16 %v1561_v60, %v1560_v59 }
 0x183   : > { %v1241_v41 = vadd.f32 %v2227_v5, %v1240_v39  ;;  %v913_v13 = vsub.f32 %v844_v7, %v881_v8 }
 0x185   : > { %v1317_v45 = vpack.c.bf16 %v1241_v41, %v1241_v41  ;;  %1583 = vmatmul.msk.bf16.gmra.mxu2 %vm1045_vm12, %v1151_v42  ;;  %v945_v23 = vmul.f32 0.5, %v913_v13  ;;  %v884_v42 = vld [vmem:[#allocation3 + $0xf8] sm:$0xff] }
 0x187   : > { %1350 = vst.msk [vmem:[%s1831_s10 + $0x8] sm:$0xf] %vm1347_vm14, %v1317_v45  ;;  %v977_v29 = vadd.f32 %v945_v23, %v881_v8  ;;  %v1559_v45 = vsel %vm1006_vm1, 1.0, %v1762_v37 }
 0x188   : > { %v845_v15 = vpop.f32.mrf.mxu3 }
 0x189   : > { %v846_v24 = vadd.f32 %v2071_v63, %v845_v15  ;;  %vm1009_vm5 = vcmp.ge.f32.partialorder %v977_v29, 1.0 }
 0x18a   : > { %v1242_v51 = vpop.f32.mrf.mxu1  ;;  %v1041_v34 = vsel %vm1009_vm5, 0.0, %v977_v29 }
 0x18b   : > { %v1243_v52 = vadd.f32 %v2227_v5, %v1242_v51  ;;  %v914_v26 = vsub.f32 %v846_v24, %v882_v16  ;;  %1074 = vst.msk [vmem:[#allocation3 + $0xe0] sm:$0xff] %vm1045_vm12, %v1041_v34  ;;  %v1154_v51 = vpack.c.bf16 %v1559_v45, %v1558_v44 }
 0x18d   : > { %v1318_v55 = vpack.c.bf16 %v1243_v52, %v1243_v52  ;;  %v946_v30 = vmul.f32 0.5, %v914_v26 }
 0x18f   : > { %1351 = vst.msk [vmem:[%s1831_s10 + $0xc] sm:$0xf] %vm1347_vm14, %v1318_v55  ;;  %v978_v17 = vadd.f32 %v946_v30, %v882_v16 }
 0x190   : > { %v848_v32 = vpop.f32.mrf.mxu3 }
 0x191   : > { %v849_v22 = vadd.f32 %v2071_v63, %v848_v32  ;;  %vm1010_vm6 = vcmp.ge.f32.partialorder %v978_v17, 1.0 }
 0x192   : > { %v1245_v62 = vpop.f32.mrf.mxu1  ;;  %v1042_v35 = vsel %vm1010_vm6, 0.0, %v978_v17  ;;  %v1563_v50 = vsel %vm1010_vm6, 1.0, %v1762_v37 }
 0x193   : > { %v1246_v1 = vadd.f32 %v2227_v5, %v1245_v62  ;;  %1075 = vst.msk [vmem:[#allocation3 + $0xe8] sm:$0xff] %vm1045_vm12, %v1042_v35  ;;  %v915_v39 = vsub.f32 %v849_v22, %v883_v33 }
 0x195   : > { %v1319_v6 = vpack.c.bf16 %v1246_v1, %v1246_v1  ;;  %1584 = vmatmul.msk.bf16.gmra.mxu2 %vm1045_vm12, %v1152_v2  ;;  %v947_v21 = vmul.f32 0.5, %v915_v39 }
 0x197   : > { %1352 = vst.msk [vmem:[%s1831_s10 + $0x10] sm:$0xf] %vm1347_vm14, %v1319_v6  ;;  %v979_v52 = vadd.f32 %v947_v21, %v883_v33  ;;  %v1562_v6 = vsel %vm1009_vm5, 1.0, %v1762_v37 }
 0x198   : > { %v850_v41 = vpop.f32.mrf.mxu3  ;;  %v1156_v8 = vpack.c.bf16 %v1563_v50, %v1562_v6 }
 0x199   : > { %v851_v46 = vadd.f32 %v2071_v63, %v850_v41  ;;  %vm1011_vm7 = vcmp.ge.f32.partialorder %v979_v52, 1.0 }
 0x19a   : > { %v1247_v11 = vpop.f32.mrf.mxu1  ;;  %v1043_v18 = vsel %vm1011_vm7, 0.0, %v979_v52  ;;  %v1564_v13 = vsel %vm1011_vm7, 1.0, %v1762_v37 }
 0x19b   : > { %v1248_v12 = vadd.f32 %v2227_v5, %v1247_v11  ;;  %v916_v48 = vsub.f32 %v851_v46, %v884_v42  ;;  %1076 = vst.msk [vmem:[#allocation3 + $0xf0] sm:$0xff] %vm1045_vm12, %v1043_v18 }
 0x19d   : > { %v1320_v14 = vpack.c.bf16 %v1248_v12, %v1248_v12  ;;  %v948_v54 = vmul.f32 0.5, %v916_v48 }
 0x19f   : > { %1353 = vst.msk [vmem:[%s1831_s10 + $0x14] sm:$0xf] %vm1347_vm14, %v1320_v14  ;;  %v980_v43 = vadd.f32 %v948_v54, %v884_v42 }
 0x1a1   : > { %vm1012_vm8 = vcmp.ge.f32.partialorder %v980_v43, 1.0 }
 0x1a2   : > { %v1250_v25 = vpop.f32.mrf.mxu1  ;;  %v1044_v63 = vsel %vm1012_vm8, 0.0, %v980_v43  ;;  %v1565_v14 = vsel %vm1012_vm8, 1.0, %v1762_v37 }
 0x1a3   : > { %v1251_v27 = vadd.f32 %v2227_v5, %v1250_v25  ;;  %1077 = vst.msk [vmem:[#allocation3 + $0xf8] sm:$0xff] %vm1045_vm12, %v1044_v63  ;;  %v1157_v19 = vpack.c.bf16 %v1565_v14, %v1564_v13 }
 0x1a5   : > { %v1321_v31 = vpack.c.bf16 %v1251_v27, %v1251_v27  ;;  %1585 = vmatmul.msk.bf16.gmra.mxu2 %vm1045_vm12, %v1153_v28 }
 0x1a7   : > { %1354 = vst.msk [vmem:[%s1831_s10 + $0x18] sm:$0xf] %vm1347_vm14, %v1321_v31 }
 0x1aa   : > { %v1252_v36 = vpop.f32.mrf.mxu1 }
 0x1ab   : > { %v1253_v38 = vadd.f32 %v2227_v5, %v1252_v36 }
 0x1ad   : > { %v1322_v40 = vpack.c.bf16 %v1253_v38, %v1253_v38 }
 0x1af   : > { %1355 = vst.msk [vmem:[%s1831_s10 + $0x1c] sm:$0xf] %vm1347_vm14, %v1322_v40 }
 0x1b2   : > { %v1255_v47 = vpop.f32.mrf.mxu1 }
 0x1b3   : > { %v1256_v49 = vadd.f32 %v2227_v5, %v1255_v47 }
 0x1b5   : > { %v1323_v55 = vpack.c.bf16 %v1256_v49, %v1256_v49  ;;  %1586 = vmatmul.msk.bf16.gmra.mxu2 %vm1045_vm12, %v1154_v51 }
 0x1b7   : > { %1356 = vst.msk [vmem:[%s1831_s10 + $0x20] sm:$0xf] %vm1347_vm14, %v1323_v55 }
 0x1ba   : > { %v1257_v56 = vpop.f32.mrf.mxu1 }
 0x1bb   : > { %v1258_v57 = vadd.f32 %v2227_v5, %v1257_v56 }
 0x1bd   : > { %v1324_v58 = vpack.c.bf16 %v1258_v57, %v1258_v57 }
 0x1bf   : > { %1357 = vst.msk [vmem:[%s1831_s10 + $0x24] sm:$0xf] %vm1347_vm14, %v1324_v58 }
 0x1c2   : > { %v1260_v61 = vpop.f32.mrf.mxu1 }
 0x1c3   : > { %v1261_v62 = vadd.f32 %v2227_v5, %v1260_v61 }
 0x1c5   : > { %v1325_v1 = vpack.c.bf16 %v1261_v62, %v1261_v62  ;;  %1587 = vmatmul.msk.bf16.gmra.mxu2 %vm1045_vm12, %v1155_v0 }
 0x1c7   : > { %1358 = vst.msk [vmem:[%s1831_s10 + $0x28] sm:$0xf] %vm1347_vm14, %v1325_v1 }
 0x1ca   : > { %v1262_v2 = vpop.f32.mrf.mxu1 }
 0x1cb   : > { %v1263_v4 = vadd.f32 %v2227_v5, %v1262_v2 }
 0x1cd   : > { %v1326_v3 = vpack.c.bf16 %v1263_v4, %v1263_v4 }
 0x1cf   : > { %1359 = vst.msk [vmem:[%s1831_s10 + $0x2c] sm:$0xf] %vm1347_vm14, %v1326_v3 }
 0x1d2   : > { %v1265_v53 = vpop.f32.mrf.mxu1 }
 0x1d3   : > { %v1266_v7 = vadd.f32 %v2227_v5, %v1265_v53 }
 0x1d5   : > { %v1327_v9 = vpack.c.bf16 %v1266_v7, %v1266_v7  ;;  %1588 = vmatmul.msk.bf16.gmra.mxu2 %vm1045_vm12, %v1156_v8 }
 0x1d7   : > { %1360 = vst.msk [vmem:[%s1831_s10 + $0x30] sm:$0xf] %vm1347_vm14, %v1327_v9 }
 0x1da   : > { %v1267_v10 = vpop.f32.mrf.mxu1 }
 0x1db   : > { %v1268_v11 = vadd.f32 %v2227_v5, %v1267_v10 }
 0x1dd   : > { %v1328_v12 = vpack.c.bf16 %v1268_v11, %v1268_v11 }
 0x1df   : > { %1361 = vst.msk [vmem:[%s1831_s10 + $0x34] sm:$0xf] %vm1347_vm14, %v1328_v12 }
 0x1e2   : > { %v1270_v15 = vpop.f32.mrf.mxu1 }
 0x1e3   : > { %v1271_v16 = vadd.f32 %v2227_v5, %v1270_v15 }
 0x1e5   : > { %v1329_v20 = vpack.c.bf16 %v1271_v16, %v1271_v16  ;;  %1589 = vmatmul.msk.bf16.gmra.mxu2 %vm1045_vm12, %v1157_v19 }
 0x1e7   : > { %1362 = vst.msk [vmem:[%s1831_s10 + $0x38] sm:$0xf] %vm1347_vm14, %v1329_v20 }
 0x1ea   : > { %v1272_v23 = vpop.f32.mrf.mxu1 }
 0x1eb   : > { %v1273_v24 = vadd.f32 %v2227_v5, %v1272_v23 }
 0x1ed   : > { %v1330_v25 = vpack.c.bf16 %v1273_v24, %v1273_v24 }
 0x1ef   : > { %1363 = vst.msk [vmem:[%s1831_s10 + $0x3c] sm:$0xf] %vm1347_vm14, %v1330_v25 }
 0x1f8   : > { %v1275_v26 = vpop.f32.mrf.mxu2 }
 0x1f9   : > { %v1276_v37 = vadd.f32 %v2227_v5, %v1275_v26 }
 0x1fb   : > { %v1331_v27 = vpack.c.bf16 %v1276_v37, %v1276_v37 }
 0x1fd   : > { %1364 = vst.msk [vmem:[%s1831_s10 + $0x40] sm:$0xf] %vm1347_vm14, %v1331_v27 }
 0x200   : > { %v1277_v28 = vpop.f32.mrf.mxu2 }
 0x201   : > { %v1278_v29 = vadd.f32 %v2227_v5, %v1277_v28 }
 0x203   : > { %v1332_v30 = vpack.c.bf16 %v1278_v29, %v1278_v29 }
 0x205   : > { %1365 = vst.msk [vmem:[%s1831_s10 + $0x44] sm:$0xf] %vm1347_vm14, %v1332_v30 }
 0x208   : > { %v1280_v31 = vpop.f32.mrf.mxu2 }
 0x209   : > { %v1281_v17 = vadd.f32 %v2227_v5, %v1280_v31 }
 0x20b   : > { %v1333_v32 = vpack.c.bf16 %v1281_v17, %v1281_v17 }
 0x20d   : > { %1366 = vst.msk [vmem:[%s1831_s10 + $0x48] sm:$0xf] %vm1347_vm14, %v1333_v32 }
 0x210   : > { %v1282_v22 = vpop.f32.mrf.mxu2 }
 0x211   : > { %v1283_v33 = vadd.f32 %v2227_v5, %v1282_v22 }
 0x213   : > { %v1334_v34 = vpack.c.bf16 %v1283_v33, %v1283_v33 }
 0x215   : > { %1367 = vst.msk [vmem:[%s1831_s10 + $0x4c] sm:$0xf] %vm1347_vm14, %v1334_v34 }
 0x218   : > { %v1285_v35 = vpop.f32.mrf.mxu2 }
 0x219   : > { %v1286_v36 = vadd.f32 %v2227_v5, %v1285_v35 }
 0x21b   : > { %v1335_v38 = vpack.c.bf16 %v1286_v36, %v1286_v36 }
 0x21d   : > { %1368 = vst.msk [vmem:[%s1831_s10 + $0x50] sm:$0xf] %vm1347_vm14, %v1335_v38 }
 0x220   : > { %v1287_v39 = vpop.f32.mrf.mxu2 }
 0x221   : > { %v1288_v40 = vadd.f32 %v2227_v5, %v1287_v39 }
 0x223   : > { %v1336_v41 = vpack.c.bf16 %v1288_v40, %v1288_v40 }
 0x225   : > { %1369 = vst.msk [vmem:[%s1831_s10 + $0x54] sm:$0xf] %vm1347_vm14, %v1336_v41 }
 0x228   : > { %v1290_v42 = vpop.f32.mrf.mxu2 }
 0x229   : > { %v1291_v44 = vadd.f32 %v2227_v5, %v1290_v42 }
 0x22b   : > { %v1337_v45 = vpack.c.bf16 %v1291_v44, %v1291_v44 }
 0x22d   : > { %1370 = vst.msk [vmem:[%s1831_s10 + $0x58] sm:$0xf] %vm1347_vm14, %v1337_v45 }
 0x230   : > { %v1292_v21 = vpop.f32.mrf.mxu2 }
 0x231   : > { %v1293_v46 = vadd.f32 %v2227_v5, %v1292_v21 }
 0x233   : > { %v1338_v47 = vpack.c.bf16 %v1293_v46, %v1293_v46 }
 0x235   : > { %1371 = vst.msk [vmem:[%s1831_s10 + $0x5c] sm:$0xf] %vm1347_vm14, %v1338_v47 }
 0x238   : > { %v1295_v48 = vpop.f32.mrf.mxu2 }
 0x239   : > { %v1296_v49 = vadd.f32 %v2227_v5, %v1295_v48 }
 0x23b   : > { %v1339_v51 = vpack.c.bf16 %v1296_v49, %v1296_v49 }
 0x23d   : > { %1372 = vst.msk [vmem:[%s1831_s10 + $0x60] sm:$0xf] %vm1347_vm14, %v1339_v51 }
 0x240   : > { %v1297_v52 = vpop.f32.mrf.mxu2 }
 0x241   : > { %v1298_v54 = vadd.f32 %v2227_v5, %v1297_v52 }
 0x243   : > { %v1340_v55 = vpack.c.bf16 %v1298_v54, %v1298_v54 }
 0x245   : > { %1373 = vst.msk [vmem:[%s1831_s10 + $0x64] sm:$0xf] %vm1347_vm14, %v1340_v55 }
 0x248   : > { %v1300_v43 = vpop.f32.mrf.mxu2 }
 0x249   : > { %v1301_v18 = vadd.f32 %v2227_v5, %v1300_v43 }
 0x24b   : > { %v1341_v63 = vpack.c.bf16 %v1301_v18, %v1301_v18 }
 0x24d   : > { %1374 = vst.msk [vmem:[%s1831_s10 + $0x68] sm:$0xf] %vm1347_vm14, %v1341_v63 }
 0x250   : > { %v1302_v56 = vpop.f32.mrf.mxu2 }
 0x251   : > { %v1303_v57 = vadd.f32 %v2227_v5, %v1302_v56 }
 0x253   : > { %v1342_v58 = vpack.c.bf16 %v1303_v57, %v1303_v57 }
 0x255   : > { %1375 = vst.msk [vmem:[%s1831_s10 + $0x6c] sm:$0xf] %vm1347_vm14, %v1342_v58 }
 0x258   : > { %v1305_v59 = vpop.f32.mrf.mxu2 }
 0x259   : > { %v1306_v60 = vadd.f32 %v2227_v5, %v1305_v59 }
 0x25b   : > { %v1343_v61 = vpack.c.bf16 %v1306_v60, %v1306_v60 }
 0x25d   : > { %1376 = vst.msk [vmem:[%s1831_s10 + $0x70] sm:$0xf] %vm1347_vm14, %v1343_v61 }
 0x260   : > { %v1307_v62 = vpop.f32.mrf.mxu2 }
 0x261   : > { %v1308_v0 = vadd.f32 %v2227_v5, %v1307_v62 }
 0x263   : > { %v1344_v1 = vpack.c.bf16 %v1308_v0, %v1308_v0 }
 0x265   : > { %1377 = vst.msk [vmem:[%s1831_s10 + $0x74] sm:$0xf] %vm1347_vm14, %v1344_v1 }
 0x268   : > { %v1310_v2 = vpop.f32.mrf.mxu2 }
 0x269   : > { %v1311_v4 = vadd.f32 %v2227_v5, %v1310_v2 }
 0x26b   : > { %v1345_v3 = vpack.c.bf16 %v1311_v4, %v1311_v4 }
 0x26d   : > { %1378 = vst.msk [vmem:[%s1831_s10 + $0x78] sm:$0xf] %vm1347_vm14, %v1345_v3 }
 0x270   : > { %v1312_v6 = vpop.f32.mrf.mxu2 }
 0x271   : > { %v1313_v50 = vadd.f32 %v2227_v5, %v1312_v6 }
 0x273   : > { %v1346_v53 = vpack.c.bf16 %v1313_v50, %v1313_v50 }
 0x275   : > { %1379 = vst.msk [vmem:[%s1831_s10 + $0x7c] sm:$0xf] %vm1347_vm14, %v1346_v53 }
 0x276 PF: > { %s15_s22 = sadd.s32 1, %s1759_s22   ;;  %s2455_s18 = smov %s1751_s20 }
 0x277   : > { %p12_p8 = scmp.ge.s32.totalorder %s15_s22, 10   ;;  %s2456_s19 = smov %s1755_s21 }
 0x278   : > { %s2457_s20 = smov %s2460_s23  ;;  %s2458_s21 = smov %s2464_s24 }
 0x279   :  { %14 = sbr.rel (!%p12_p8) target bundleno = 3 (0x3), region = 74 }

</bundles_post_ra>
